<compile_context>
chip_gen: v7x
topology: tpu7x:2x2x1
jax: 0.10.0
libtpu: 0.0.40
codegen_flags: <defaults>
</compile_context>

<pallas_src>
import functools

import jax
import jax.numpy as jnp
import numpy as np
from jax.experimental import pallas as pl
from jax.experimental.pallas import tpu as pltpu

NUM_CATEGORIES = 30
N_PAD = 128                     # lane-dense padded output width
D_IN, D_H1, D_H2 = 1024, 512, 256
BN_EPS = 1e-5


def _round_up(n, m):
    return ((n + m - 1) // m) * m


@functools.lru_cache(maxsize=1)
def _large_tile_rows():
    """Large-batch tile: 2048 rows on 128 MiB-VMEM chips, 1024 on v7x (64 MiB)."""
    try:
        info = pltpu.get_tpu_info()
        vmem = int(getattr(info, "vmem_capacity_bytes", 0))
    except Exception:
        vmem = 0
    return 2048 if vmem >= (96 << 20) else 1024


def _pick_tile_m(B):
    large = _large_tile_rows()
    if B <= 256:
        # Single small tile (sublane-aligned).
        return _round_up(max(B, 8), 8)
    if B <= 1024:
        # >= 2 grid tiles so the "parallel" batch axis shards across both
        # v7x TensorCores (no effect on single-TC v5e/v6e).
        return min(_round_up(pl.cdiv(B, 2), 256), large)
    return large


def _cls_kernel(x_ref, w1_ref, sh1_ref, w2_ref, b2_ref, w3_ref, b3_ref, o_ref):
    # ---- linear1 (BN1 folded into W1/sh1) + relu ----   x is already bf16
    h1 = jnp.dot(x_ref[...], w1_ref[...], preferred_element_type=jnp.float32)
    h1 = jnp.maximum(h1 + sh1_ref[...], 0.0)
    # ---- (dropout1: identity in eval) ----
    # ---- linear2 (bias + BN2 folded into W2/b2') + relu ----
    h2 = jnp.dot(h1.astype(jnp.bfloat16), w2_ref[...],
                 preferred_element_type=jnp.float32)
    h2 = jnp.maximum(h2 + b2_ref[...], 0.0)
    # ---- (dropout2: identity in eval) ----
    # ---- linear3 + bias (N padded to 128) ----
    o_ref[...] = (jnp.dot(h2.astype(jnp.bfloat16), w3_ref[...],
                          preferred_element_type=jnp.float32)
                  + b3_ref[...]).astype(o_ref.dtype)


def classification_forward(x, params, full_output=False):
    """x: [B, 1024], ideally already bf16 (produced in bf16 upstream).

    params: folded kernel params from fold_params().
    full_output=True returns the padded [B_pad, 128] logits (lets the consumer
    fuse the [:B, :30] slice instead of paying a separate HBM copy).
    """
    B = x.shape[0]
    if x.dtype != jnp.bfloat16:
        # Prefer emitting bf16 from the producer; this cast is a fallback.
        x = x.astype(jnp.bfloat16)

    TILE_M = _pick_tile_m(B)
    B_pad = _round_up(B, TILE_M)
    if B_pad != B:
        x = jnp.pad(x, ((0, B_pad - B), (0, 0)))
    num_tiles = B_pad // TILE_M

    operands = (
        x,
        params["w1"], params["sh1"],
        params["w2"], params["b2"],
        params["w3"], params["b3"],
    )

    def resident_spec(a):
        # Weights/biases: same block every grid step -> resident in VMEM,
        # single-buffered (no wasted double-buffer allocation).
        return pl.BlockSpec(a.shape, lambda i: (0, 0),
                            pipeline_mode=pl.Buffered(1))

    in_specs = [pl.BlockSpec((TILE_M, D_IN), lambda i: (i, 0))] + [
        resident_spec(a) for a in operands[1:]
    ]

    weight_bytes = sum(int(np.prod(params[k].shape)) * params[k].dtype.itemsize
                       for k in ("w1", "sh1", "w2", "b2", "w3", "b3"))
    cost = pl.CostEstimate(
        flops=2 * B_pad * (D_IN * D_H1 + D_H1 * D_H2 + D_H2 * N_PAD),
        transcendentals=0,
        bytes_accessed=B_pad * D_IN * 2 + B_pad * N_PAD * 4 + weight_bytes,
    )

    out = pl.pallas_call(
        _cls_kernel,
        out_shape=jax.ShapeDtypeStruct((B_pad, N_PAD), jnp.float32),
        grid=(num_tiles,),
        in_specs=in_specs,
        out_specs=pl.BlockSpec((TILE_M, N_PAD), lambda i: (i, 0)),
        compiler_params=pltpu.CompilerParams(
            dimension_semantics=("parallel",),
            vmem_limit_bytes=48 << 20,
        ),
        cost_estimate=cost,
    )(*operands)

    if full_output:
        return out
    return out[:B, :NUM_CATEGORIES]


def make_raw_params(key):
    """Synthetic parameters in PyTorch layout/semantics (weights pre-transposed [in,out])."""
    ks = jax.random.split(key, 12)
    w1 = jax.random.normal(ks[0], (D_IN, D_H1), jnp.float32) * 0.02
    w2 = jax.random.normal(ks[1], (D_H1, D_H2), jnp.float32) * 0.02
    b2 = jax.random.normal(ks[2], (D_H2,), jnp.float32) * 0.01
    w3 = jax.random.normal(ks[3], (D_H2, NUM_CATEGORIES), jnp.float32) * 0.02
    b3 = jax.random.normal(ks[4], (NUM_CATEGORIES,), jnp.float32) * 0.01

    g1 = 1.0 + 0.1 * jax.random.normal(ks[5], (D_H1,), jnp.float32)
    be1 = 0.1 * jax.random.normal(ks[6], (D_H1,), jnp.float32)
    m1 = 0.1 * jax.random.normal(ks[7], (D_H1,), jnp.float32)
    v1 = jnp.abs(1.0 + 0.1 * jax.random.normal(ks[8], (D_H1,), jnp.float32))

    g2 = 1.0 + 0.1 * jax.random.normal(ks[9], (D_H2,), jnp.float32)
    be2 = 0.1 * jax.random.normal(ks[10], (D_H2,), jnp.float32)
    m2 = 0.1 * jax.random.normal(ks[11], (D_H2,), jnp.float32)
    v2 = jnp.ones((D_H2,), jnp.float32)

    return dict(w1=w1, w2=w2, b2=b2, w3=w3, b3=b3,
                g1=g1, be1=be1, m1=m1, v1=v1,
                g2=g2, be2=be2, m2=m2, v2=v2)


def fold_params(raw):
    """Fold BN + biases into bf16 weights / f32 shifts; pad final N to 128."""
    s1 = raw["g1"] * jax.lax.rsqrt(raw["v1"] + BN_EPS)
    sh1 = raw["be1"] - raw["m1"] * s1
    s2 = raw["g2"] * jax.lax.rsqrt(raw["v2"] + BN_EPS)
    sh2 = raw["be2"] - raw["m2"] * s2

    w1f = (raw["w1"] * s1[None, :]).astype(jnp.bfloat16)
    w2f = (raw["w2"] * s2[None, :]).astype(jnp.bfloat16)
    b2f = (raw["b2"] * s2 + sh2).astype(jnp.float32)

    w3p = jnp.zeros((D_H2, N_PAD), jnp.float32).at[:, :NUM_CATEGORIES].set(raw["w3"])
    b3p = jnp.zeros((N_PAD,), jnp.float32).at[:NUM_CATEGORIES].set(raw["b3"])

    return {
        "w1": w1f, "sh1": sh1.reshape(1, D_H1).astype(jnp.float32),
        "w2": w2f, "b2": b2f.reshape(1, D_H2),
        "w3": w3p.astype(jnp.bfloat16), "b3": b3p.reshape(1, N_PAD),
    }


def reference_forward(x, raw):
    """Unfolded f32 reference matching the PyTorch eval-mode forward."""
    h1 = x @ raw["w1"]
    h1 = (h1 - raw["m1"]) * jax.lax.rsqrt(raw["v1"] + BN_EPS) * raw["g1"] + raw["be1"]
    h1 = jnp.maximum(h1, 0.0)
    h2 = h1 @ raw["w2"] + raw["b2"]
    h2 = (h2 - raw["m2"]) * jax.lax.rsqrt(raw["v2"] + BN_EPS) * raw["g2"] + raw["be2"]
    h2 = jnp.maximum(h2, 0.0)
    return h2 @ raw["w3"] + raw["b3"]


def _check(B, raw, params, fwd):
    kx = jax.random.PRNGKey(B)
    x_f32 = jax.random.normal(kx, (B, D_IN), jnp.float32)
    # Producer emits bf16 activations (fused cast upstream); reference uses the
    # same bf16-rounded input in f32 so we only measure kernel-internal error.
    x_bf16 = x_f32.astype(jnp.bfloat16)
    out = jax.block_until_ready(fwd(x_bf16, params))
    ref = reference_forward(x_bf16.astype(jnp.float32), raw)
    np.testing.assert_allclose(np.asarray(out), np.asarray(ref),
                               rtol=2e-2, atol=2e-2)
    assert out.shape == (B, NUM_CATEGORIES)


if __name__ == "__main__":
    key = jax.random.PRNGKey(0)
    raw = make_raw_params(key)
    params = fold_params(raw)

    fwd = jax.jit(classification_forward, static_argnames=("full_output",))

    _check(8, raw, params, fwd)      # small-batch single-tile path
    _check(260, raw, params, fwd)    # mid-size path: 2 tiles (both v7x TCs busy)

    print("KERNEL_OK")
</pallas_src>

<mosaic_0001>
module attributes {stable_mosaic.version = 11 : i64} {
  func.func @_cls_kernel(%arg0: i32, %arg1: memref<8x1024xbf16, #tpu.memory_space<vmem>>, %arg2: memref<1024x512xbf16, #tpu.memory_space<vmem>>, %arg3: memref<1x512xf32, #tpu.memory_space<vmem>>, %arg4: memref<512x256xbf16, #tpu.memory_space<vmem>>, %arg5: memref<1x256xf32, #tpu.memory_space<vmem>>, %arg6: memref<256x128xbf16, #tpu.memory_space<vmem>>, %arg7: memref<1x128xf32, #tpu.memory_space<vmem>>, %arg8: memref<8x128xf32, #tpu.memory_space<vmem>>) attributes {dimension_semantics = [#tpu.dimension_semantics<parallel>], iteration_bounds = array<i64: 1>, scalar_prefetch = 0 : i64, scratch_operands = 0 : i64, tpu.core_type = #tpu.core_type<tc>, window_params = [{transform_indices = @transform_0, window_bounds = array<i64: 8, 1024>}, {pipeline_mode = #tpu.pipeline_mode<synchronous>, transform_indices = @transform_1, window_bounds = array<i64: 1024, 512>}, {pipeline_mode = #tpu.pipeline_mode<synchronous>, transform_indices = @transform_2, window_bounds = array<i64: 1, 512>}, {pipeline_mode = #tpu.pipeline_mode<synchronous>, transform_indices = @transform_3, window_bounds = array<i64: 512, 256>}, {pipeline_mode = #tpu.pipeline_mode<synchronous>, transform_indices = @transform_4, window_bounds = array<i64: 1, 256>}, {pipeline_mode = #tpu.pipeline_mode<synchronous>, transform_indices = @transform_5, window_bounds = array<i64: 256, 128>}, {pipeline_mode = #tpu.pipeline_mode<synchronous>, transform_indices = @transform_6, window_bounds = array<i64: 1, 128>}, {transform_indices = @transform_7, window_bounds = array<i64: 8, 128>}]} {
    %c0 = arith.constant 0 : index
    %c0_0 = arith.constant 0 : index
    %0 = vector.load %arg1[%c0, %c0_0] : memref<8x1024xbf16, #tpu.memory_space<vmem>>, vector<8x1024xbf16>
    %c0_1 = arith.constant 0 : index
    %c0_2 = arith.constant 0 : index
    %1 = vector.load %arg2[%c0_1, %c0_2] : memref<1024x512xbf16, #tpu.memory_space<vmem>>, vector<1024x512xbf16>
    %cst = arith.constant dense<0.000000e+00> : vector<8x512xf32>
    %2 = tpu.matmul %0, %1, %cst {dimension_numbers = #tpu.dot_dimension_numbers<[1], [0], [0], [1], [0, 0, 1, 1], [], []>} : vector<8x1024xbf16>, vector<1024x512xbf16>, vector<8x512xf32> -> vector<8x512xf32>
    %c0_3 = arith.constant 0 : index
    %c0_4 = arith.constant 0 : index
    %3 = vector.load %arg3[%c0_3, %c0_4] : memref<1x512xf32, #tpu.memory_space<vmem>>, vector<1x512xf32>
    %4 = vector.broadcast %3 : vector<1x512xf32> to vector<8x512xf32>
    %5 = arith.addf %2, %4 : vector<8x512xf32>
    %cst_5 = arith.constant 0.000000e+00 : f32
    %6 = vector.broadcast %cst_5 : f32 to vector<8x512xf32>
    %7 = arith.maximumf %5, %6 : vector<8x512xf32>
    %8 = arith.truncf %7 : vector<8x512xf32> to vector<8x512xbf16>
    %c0_6 = arith.constant 0 : index
    %c0_7 = arith.constant 0 : index
    %9 = vector.load %arg4[%c0_6, %c0_7] : memref<512x256xbf16, #tpu.memory_space<vmem>>, vector<512x256xbf16>
    %cst_8 = arith.constant dense<0.000000e+00> : vector<8x256xf32>
    %10 = tpu.matmul %8, %9, %cst_8 {dimension_numbers = #tpu.dot_dimension_numbers<[1], [0], [0], [1], [0, 0, 1, 1], [], []>} : vector<8x512xbf16>, vector<512x256xbf16>, vector<8x256xf32> -> vector<8x256xf32>
    %c0_9 = arith.constant 0 : index
    %c0_10 = arith.constant 0 : index
    %11 = vector.load %arg5[%c0_9, %c0_10] : memref<1x256xf32, #tpu.memory_space<vmem>>, vector<1x256xf32>
    %12 = vector.broadcast %11 : vector<1x256xf32> to vector<8x256xf32>
    %13 = arith.addf %10, %12 : vector<8x256xf32>
    %cst_11 = arith.constant 0.000000e+00 : f32
    %14 = vector.broadcast %cst_11 : f32 to vector<8x256xf32>
    %15 = arith.maximumf %13, %14 : vector<8x256xf32>
    %16 = arith.truncf %15 : vector<8x256xf32> to vector<8x256xbf16>
    %c0_12 = arith.constant 0 : index
    %c0_13 = arith.constant 0 : index
    %17 = vector.load %arg6[%c0_12, %c0_13] : memref<256x128xbf16, #tpu.memory_space<vmem>>, vector<256x128xbf16>
    %cst_14 = arith.constant dense<0.000000e+00> : vector<8x128xf32>
    %18 = tpu.matmul %16, %17, %cst_14 {dimension_numbers = #tpu.dot_dimension_numbers<[1], [0], [0], [1], [0, 0, 1, 1], [], []>} : vector<8x256xbf16>, vector<256x128xbf16>, vector<8x128xf32> -> vector<8x128xf32>
    %c0_15 = arith.constant 0 : index
    %c0_16 = arith.constant 0 : index
    %19 = vector.load %arg7[%c0_15, %c0_16] : memref<1x128xf32, #tpu.memory_space<vmem>>, vector<1x128xf32>
    %20 = vector.broadcast %19 : vector<1x128xf32> to vector<8x128xf32>
    %21 = arith.addf %18, %20 : vector<8x128xf32>
    %c0_17 = arith.constant 0 : index
    %c0_18 = arith.constant 0 : index
    %22 = vector.load %arg8[%c0_17, %c0_18] : memref<8x128xf32, #tpu.memory_space<vmem>>, vector<8x128xf32>
    tpu.vector_store %arg8[%c0_17, %c0_18], %21 {strides = array<i32>} : memref<8x128xf32, #tpu.memory_space<vmem>>, vector<8x128xf32>,
    return
  }
  func.func @transform_0(%arg0: i32) -> (i32, i32) {
    %c0_i32 = arith.constant 0 : i32
    %c0_i32_0 = arith.constant 0 : i32
    return %arg0, %c0_i32 : i32, i32
  }
  func.func @transform_1(%arg0: i32) -> (i32, i32) {
    %c0_i32 = arith.constant 0 : i32
    %c0_i32_0 = arith.constant 0 : i32
    %c0_i32_1 = arith.constant 0 : i32
    return %c0_i32, %c0_i32_0 : i32, i32
  }
  func.func @transform_2(%arg0: i32) -> (i32, i32) {
    %c0_i32 = arith.constant 0 : i32
    %c0_i32_0 = arith.constant 0 : i32
    %c0_i32_1 = arith.constant 0 : i32
    return %c0_i32, %c0_i32_0 : i32, i32
  }
  func.func @transform_3(%arg0: i32) -> (i32, i32) {
    %c0_i32 = arith.constant 0 : i32
    %c0_i32_0 = arith.constant 0 : i32
    %c0_i32_1 = arith.constant 0 : i32
    return %c0_i32, %c0_i32_0 : i32, i32
  }
  func.func @transform_4(%arg0: i32) -> (i32, i32) {
    %c0_i32 = arith.constant 0 : i32
    %c0_i32_0 = arith.constant 0 : i32
    %c0_i32_1 = arith.constant 0 : i32
    return %c0_i32, %c0_i32_0 : i32, i32
  }
  func.func @transform_5(%arg0: i32) -> (i32, i32) {
    %c0_i32 = arith.constant 0 : i32
    %c0_i32_0 = arith.constant 0 : i32
    %c0_i32_1 = arith.constant 0 : i32
    return %c0_i32, %c0_i32_0 : i32, i32
  }
  func.func @transform_6(%arg0: i32) -> (i32, i32) {
    %c0_i32 = arith.constant 0 : i32
    %c0_i32_0 = arith.constant 0 : i32
    %c0_i32_1 = arith.constant 0 : i32
    return %c0_i32, %c0_i32_0 : i32, i32
  }
  func.func @transform_7(%arg0: i32) -> (i32, i32) {
    %c0_i32 = arith.constant 0 : i32
    %c0_i32_0 = arith.constant 0 : i32
    return %arg0, %c0_i32 : i32, i32
  }
}

</mosaic_0001>

<bundles_post_ra>
// kernel: classification_forward.1
= control target key start
LH: loop header
LB: loop body
LE: loop exit
PB: predicated region body
PF: predicated region fallthrough
CT: control target
= control target key end

     0   :  { %12 = vsyncpa [#allocation3], 0  ;;  %s3898_s0 = inlined_call_operand.hbm [shape: bf16[8,1024], index: 0, kind: input, shape index: {}]   ;;  %s3899_s1 = inlined_call_operand.hbm [shape: bf16[1024,512], index: 1, kind: input, shape index: {}]   ;;  %s3900_s2 = inlined_call_operand.vmem [shape: f32[1,512], index: 2, kind: input, shape index: {}]   ;;  %s3901_s3 = inlined_call_operand.hbm [shape: bf16[512,256], index: 3, kind: input, shape index: {}]   ;;  %s3902_s4 = inlined_call_operand.vmem [shape: f32[1,256], index: 4, kind: input, shape index: {}]   ;;  %s3903_s5 = inlined_call_operand.hbm [shape: bf16[256,128], index: 5, kind: input, shape index: {}]   ;;  %s3904_s6 = inlined_call_operand.vmem [shape: f32[1,128], index: 6, kind: input, shape index: {}]   ;;  %s3905_s7 = inlined_call_operand.hbm [shape: f32[8,128], index: 7, kind: output, shape index: {}]  }
   0x1   :  { %13 = vsyncpa [#allocation6], 0 }
   0x2   :  { %14 = vsyncpa [#allocation9], 0 }
   0x3   :  { %15 = vsyncpa [#allocation4], 0  ;;  %s3714_s24 = smov [#allocation5]   ;;  %s3596_s28 = scalar_lea.hbm %s3899_s1, 32768 }
   0x4   :  { %s31_s25 = sshll.u32 %s3714_s24, 4  ;;  %p3597_p0 = scmp.ne.s32.totalorder %s3899_s1, %s3596_s28  ;;  %s32_s25 = int_to_ptr.vmem [resolvable:$true] %s31_s25 }
   0x5   :  { %p3600_p1 = scmp.lt.u32.totalorder %s3596_s28, %s3899_s1 }
   0x7   :  { %p3602_p2 = pnand %p3600_p1, %p3597_p0 }
   0x9   :  { %3605 = shalt.err (!%p3602_p2)
}
   0xa   :  { %s3606_s10 = scalar_lea.vmem %s32_s25, 32768  ;;  %p3611_p4 = scmp.lt.s32.totalorder %s32_s25, %s32_s25 }
   0xb   :  { %p3607_p3 = scmp.ne.s32.totalorder %s32_s25, %s3606_s10  ;;  %p3612_p5 = scmp.lt.s32.totalorder %s3606_s10, %s3606_s10 }
   0xd   :  { %p3613_p6 = por %p3612_p5, %p3611_p4 }
   0xf   :  { %p3614_p7 = pnand %p3613_p6, %p3607_p3 }
  0x11   :  { %3617 = shalt.err (!%p3614_p7)
}
  0x12   :  { %s3715_s11 = smov 256   ;;  %s3716_s12 = smov 16  }
  0x13   :  { %37 = dma.hbm_to_vmem [thread:$0]  %s3899_s1, 32768, %s32_s25, [#allocation6], %s3715_s11, %s3715_s11, %s3716_s12  }
  0x14   :  { %s3717_s15 = smov [#allocation2]   ;;  %s3718_s17 = smov [#allocation7]  }
  0x15   :  { %s22_s16 = sshll.u32 %s3717_s15, 4  ;;  %s45_s18 = sshll.u32 %s3718_s17, 4  ;;  %s23_s16 = int_to_ptr.vmem [resolvable:$true] %s22_s16  ;;  %s46_s18 = int_to_ptr.vmem [resolvable:$true] %s45_s18 }
  0x16   :  { %s3618_s21 = scalar_lea.hbm %s3898_s0, 512 }
  0x17   :  { %p3619_p8 = scmp.ne.s32.totalorder %s3898_s0, %s3618_s21  ;;  %p3622_p9 = scmp.lt.u32.totalorder %s3618_s21, %s3898_s0 }
  0x19   :  { %p3624_p10 = pnand %p3622_p9, %p3619_p8 }
  0x1b   :  { %3627 = shalt.err (!%p3624_p10)
}
  0x1c   :  { %s3628_s1 = scalar_lea.vmem %s23_s16, 512  ;;  %p3633_p12 = scmp.lt.s32.totalorder %s23_s16, %s23_s16 }
  0x1d   :  { %p3629_p11 = scmp.ne.s32.totalorder %s23_s16, %s3628_s1  ;;  %p3634_p13 = scmp.lt.s32.totalorder %s3628_s1, %s3628_s1 }
  0x1f   :  { %p3635_p0 = por %p3634_p13, %p3633_p12 }
  0x21   :  { %p3636_p1 = pnand %p3635_p0, %p3629_p11 }
  0x23   :  { %3639 = shalt.err (!%p3636_p1)
}
  0x24   :  { %25 = dma.hbm_to_vmem [thread:$0]  %s3898_s0, 512, %s23_s16, [#allocation3]  }
  0x25   :  { %s3640_s30 = scalar_lea.hbm %s3901_s3, 8192 }
  0x26   :  { %p3641_p2 = scmp.ne.s32.totalorder %s3901_s3, %s3640_s30  ;;  %p3644_p3 = scmp.lt.u32.totalorder %s3640_s30, %s3901_s3 }
  0x28   :  { %p3646_p4 = pnand %p3644_p3, %p3641_p2 }
  0x2a   :  { %3649 = shalt.err (!%p3646_p4)
}
  0x2b   :  { %s3650_s12 = scalar_lea.vmem %s46_s18, 8192  ;;  %p3655_p6 = scmp.lt.s32.totalorder %s46_s18, %s46_s18 }
  0x2c   :  { %p3651_p5 = scmp.ne.s32.totalorder %s46_s18, %s3650_s12  ;;  %p3656_p7 = scmp.lt.s32.totalorder %s3650_s12, %s3650_s12 }
  0x2e   :  { %p3657_p8 = por %p3656_p7, %p3655_p6 }
  0x30   :  { %p3658_p9 = pnand %p3657_p8, %p3651_p5 }
  0x32   :  { %3661 = shalt.err (!%p3658_p9)
}
  0x33   :  { %s3719_s0 = smov 128   ;;  %s3720_s13 = smov 8  }
  0x34   :  { %51 = dma.hbm_to_vmem [thread:$0]  %s3901_s3, 8192, %s46_s18, [#allocation6], %s3719_s0, %s3719_s0, %s3720_s13  }
  0x35   :  { %s3721_s16 = smov [#allocation8]   ;;  %s3662_s21 = scalar_lea.hbm %s3903_s5, 2048 }
  0x36   :  { %s59_s17 = sshll.u32 %s3721_s16, 4  ;;  %p3663_p10 = scmp.ne.s32.totalorder %s3903_s5, %s3662_s21  ;;  %s60_s17 = int_to_ptr.vmem [resolvable:$true] %s59_s17 }
  0x37   :  { %p3666_p11 = scmp.lt.u32.totalorder %s3662_s21, %s3903_s5 }
  0x39   :  { %p3668_p12 = pnand %p3666_p11, %p3663_p10 }
  0x3b   :  { %3671 = shalt.err (!%p3668_p12)
}
  0x3c   :  { %s3672_s1 = scalar_lea.vmem %s60_s17, 2048  ;;  %p3677_p0 = scmp.lt.s32.totalorder %s60_s17, %s60_s17 }
  0x3d   :  { %p3673_p13 = scmp.ne.s32.totalorder %s60_s17, %s3672_s1  ;;  %p3678_p1 = scmp.lt.s32.totalorder %s3672_s1, %s3672_s1 }
  0x3f   :  { %p3679_p2 = por %p3678_p1, %p3677_p0 }
  0x41   :  { %p3680_p3 = pnand %p3679_p2, %p3673_p13 }
  0x43   :  { %3683 = shalt.err (!%p3680_p3)
}
  0x44   :  { %s3722_s3 = smov 64   ;;  %s3723_s18 = smov 4  }
  0x45   :  { %65 = dma.hbm_to_vmem [thread:$0]  %s3903_s5, 2048, %s60_s17, [#allocation9], %s3722_s3, %s3722_s3, %s3723_s18  }
  0x46   :  { %3706 = dma.done.wait [#allocation3], 512  }
  0x47   :  { %3707 = vsyncadd [#allocation3], 4294966784 }
  0x48   :  { %3708 = dma.done.wait [#allocation6], 40960  }
  0x49   :  { %3709 = vsyncadd [#allocation6], 4294926336 }
  0x4a   :  { %3710 = dma.done.wait [#allocation9], 2048  }
  0x4b   :  { %3711 = vsyncadd [#allocation9], 4294965248  ;;  %v3092_v0 = vld [vmem:[#allocation5 + $0x4] ss:$16 sps:$4 sm:$0xff]   ;;  %v3096_v2 = vld [vmem:[#allocation5] ss:$16 sps:$4 sm:$0xff]  }
  0x4c   :  { %v3094_v1 = vld [vmem:[#allocation5 + $0x204] ss:$16 sps:$4 sm:$0xff]   ;;  %1671 = vmatprep.subr.bf16.mxu1 %v3092_v0  ;;  %v3097_v3 = vld [vmem:[#allocation5 + $0x200] ss:$16 sps:$4 sm:$0xff]   ;;  %v82_v48 = vld [vmem:[#allocation2 + $0x8] sm:$0xff]  ;;  %s3724_s8 = smov [#allocation10]  }
  0x4d   :  { %1712 = vmatprep.subr.bf16.mxu0 %v3094_v1  ;;  %v3098_v4 = vld [vmem:[#allocation5 + $0x24] ss:$16 sps:$4 sm:$0xff]   ;;  %1672 = vmatpush1.bf16.msra.mxu1 %v3096_v2  ;;  %v3102_v6 = vld [vmem:[#allocation5 + $0x20] ss:$16 sps:$4 sm:$0xff]   ;;  %v3815_v51 = vcombine.high %v82_v48, %v82_v48  ;;  %s2671_s9 = sshll.u32 %s3724_s8, 4  ;;  %s2672_s9 = int_to_ptr.vmem [resolvable:$true] %s2671_s9 }
  0x4e   :  { %1713 = vmatpush1.bf16.msra.mxu0 %v3097_v3  ;;  %v3100_v5 = vld [vmem:[#allocation5 + $0x224] ss:$16 sps:$4 sm:$0xff]   ;;  %1673 = vmatprep.subr.bf16.mxu1 %v3098_v4  ;;  %v3103_v7 = vld [vmem:[#allocation5 + $0x220] ss:$16 sps:$4 sm:$0xff]   ;;  %s3684_s10 = scalar_lea.vmem %s2672_s9, 128  ;;  %p3689_p5 = scmp.lt.s32.totalorder %s2672_s9, %s2672_s9 }
  0x4f   :  { %1714 = vmatprep.subr.bf16.mxu0 %v3100_v5  ;;  %v3104_v8 = vld [vmem:[#allocation5 + $0x44] ss:$16 sps:$4 sm:$0xff]   ;;  %v3108_v10 = vld [vmem:[#allocation5 + $0x40] ss:$16 sps:$4 sm:$0xff]   ;;  %1744 = vmatprep.mubr.bf16.mxu0 %v3815_v51  ;;  %v3197_v5 = vld [vmem:[#allocation5 + $0xc] ss:$16 sps:$4 sm:$0xff]   ;;  %p3685_p4 = scmp.ne.s32.totalorder %s2672_s9, %s3684_s10  ;;  %p3690_p6 = scmp.lt.s32.totalorder %s3684_s10, %s3684_s10 }
  0x50   :  { %v3106_v9 = vld [vmem:[#allocation5 + $0x244] ss:$16 sps:$4 sm:$0xff]   ;;  %v3109_v11 = vld [vmem:[#allocation5 + $0x240] ss:$16 sps:$4 sm:$0xff]  }
  0x51   :  { %1674 = vmatpush1.bf16.msra.mxu1 %v3102_v6  ;;  %v3110_v12 = vld [vmem:[#allocation5 + $0x64] ss:$16 sps:$4 sm:$0xff]   ;;  %v3114_v14 = vld [vmem:[#allocation5 + $0x60] ss:$16 sps:$4 sm:$0xff]   ;;  %p3691_p7 = por %p3690_p6, %p3689_p5 }
  0x52   :  { %1715 = vmatpush1.bf16.msra.mxu0 %v3103_v7  ;;  %1675 = vmatprep.subr.bf16.mxu1 %v3104_v8  ;;  %v3112_v13 = vld [vmem:[#allocation5 + $0x264] ss:$16 sps:$4 sm:$0xff]   ;;  %v3115_v15 = vld [vmem:[#allocation5 + $0x260] ss:$16 sps:$4 sm:$0xff]   ;;  %v3821_v7 = vcombine.low %v82_v48, %v82_v48 }
  0x53   :  { %1716 = vmatprep.subr.bf16.mxu0 %v3106_v9  ;;  %v3116_v16 = vld [vmem:[#allocation5 + $0x84] ss:$16 sps:$4 sm:$0xff]   ;;  %v3120_v18 = vld [vmem:[#allocation5 + $0x80] ss:$16 sps:$4 sm:$0xff]   ;;  %v3195_v9 = vld [vmem:[#allocation5 + $0x8] ss:$16 sps:$4 sm:$0xff]   ;;  %p3692_p8 = pnand %p3691_p7, %p3685_p4 }
  0x54   :  { %v3118_v17 = vld [vmem:[#allocation5 + $0x284] ss:$16 sps:$4 sm:$0xff]   ;;  %v3121_v19 = vld [vmem:[#allocation5 + $0x280] ss:$16 sps:$4 sm:$0xff]  }
  0x55   :  { %1676 = vmatpush1.bf16.msra.mxu1 %v3108_v10  ;;  %v3122_v20 = vld [vmem:[#allocation5 + $0xa4] ss:$16 sps:$4 sm:$0xff]   ;;  %v3126_v22 = vld [vmem:[#allocation5 + $0xa0] ss:$16 sps:$4 sm:$0xff]  }
  0x56   :  { %1717 = vmatpush1.bf16.msra.mxu0 %v3109_v11  ;;  %1677 = vmatprep.subr.bf16.mxu1 %v3110_v12  ;;  %v3124_v21 = vld [vmem:[#allocation5 + $0x2a4] ss:$16 sps:$4 sm:$0xff]   ;;  %v3127_v23 = vld [vmem:[#allocation5 + $0x2a0] ss:$16 sps:$4 sm:$0xff]   ;;  %v3203_v11 = vld [vmem:[#allocation5 + $0x2c] ss:$16 sps:$4 sm:$0xff]  }
  0x57   :  { %1718 = vmatprep.subr.bf16.mxu0 %v3112_v13  ;;  %v3128_v24 = vld [vmem:[#allocation5 + $0xc4] ss:$16 sps:$4 sm:$0xff]   ;;  %v3132_v26 = vld [vmem:[#allocation5 + $0xc0] ss:$16 sps:$4 sm:$0xff]   ;;  %v3201_v13 = vld [vmem:[#allocation5 + $0x28] ss:$16 sps:$4 sm:$0xff]  }
  0x58   :  { %v3130_v25 = vld [vmem:[#allocation5 + $0x2c4] ss:$16 sps:$4 sm:$0xff]   ;;  %v3133_v27 = vld [vmem:[#allocation5 + $0x2c0] ss:$16 sps:$4 sm:$0xff]  }
  0x59   :  { %1678 = vmatpush1.bf16.msra.mxu1 %v3114_v14  ;;  %v3134_v28 = vld [vmem:[#allocation5 + $0xe4] ss:$16 sps:$4 sm:$0xff]   ;;  %v3138_v30 = vld [vmem:[#allocation5 + $0xe0] ss:$16 sps:$4 sm:$0xff]  }
  0x5a   :  { %1719 = vmatpush1.bf16.msra.mxu0 %v3115_v15  ;;  %1679 = vmatprep.subr.bf16.mxu1 %v3116_v16  ;;  %v3136_v29 = vld [vmem:[#allocation5 + $0x2e4] ss:$16 sps:$4 sm:$0xff]   ;;  %v3139_v31 = vld [vmem:[#allocation5 + $0x2e0] ss:$16 sps:$4 sm:$0xff]   ;;  %v3209_v15 = vld [vmem:[#allocation5 + $0x4c] ss:$16 sps:$4 sm:$0xff]  }
  0x5b   :  { %1720 = vmatprep.subr.bf16.mxu0 %v3118_v17  ;;  %v3140_v32 = vld [vmem:[#allocation5 + $0x104] ss:$16 sps:$4 sm:$0xff]   ;;  %v3144_v34 = vld [vmem:[#allocation5 + $0x100] ss:$16 sps:$4 sm:$0xff]   ;;  %v3207_v17 = vld [vmem:[#allocation5 + $0x48] ss:$16 sps:$4 sm:$0xff]  }
  0x5c   :  { %v3142_v33 = vld [vmem:[#allocation5 + $0x304] ss:$16 sps:$4 sm:$0xff]   ;;  %v3145_v35 = vld [vmem:[#allocation5 + $0x300] ss:$16 sps:$4 sm:$0xff]  }
  0x5d   :  { %1680 = vmatpush1.bf16.msra.mxu1 %v3120_v18  ;;  %v3146_v36 = vld [vmem:[#allocation5 + $0x124] ss:$16 sps:$4 sm:$0xff]   ;;  %v3150_v38 = vld [vmem:[#allocation5 + $0x120] ss:$16 sps:$4 sm:$0xff]  }
  0x5e   :  { %1721 = vmatpush1.bf16.msra.mxu0 %v3121_v19  ;;  %1681 = vmatprep.subr.bf16.mxu1 %v3122_v20  ;;  %v3148_v37 = vld [vmem:[#allocation5 + $0x324] ss:$16 sps:$4 sm:$0xff]   ;;  %v3151_v39 = vld [vmem:[#allocation5 + $0x320] ss:$16 sps:$4 sm:$0xff]   ;;  %v3215_v19 = vld [vmem:[#allocation5 + $0x6c] ss:$16 sps:$4 sm:$0xff]  }
  0x5f   :  { %1722 = vmatprep.subr.bf16.mxu0 %v3124_v21  ;;  %v3152_v40 = vld [vmem:[#allocation5 + $0x144] ss:$16 sps:$4 sm:$0xff]   ;;  %v3156_v42 = vld [vmem:[#allocation5 + $0x140] ss:$16 sps:$4 sm:$0xff]   ;;  %v3213_v21 = vld [vmem:[#allocation5 + $0x68] ss:$16 sps:$4 sm:$0xff]  }
  0x60   :  { %v3154_v41 = vld [vmem:[#allocation5 + $0x344] ss:$16 sps:$4 sm:$0xff]   ;;  %v3157_v43 = vld [vmem:[#allocation5 + $0x340] ss:$16 sps:$4 sm:$0xff]  }
  0x61   :  { %1682 = vmatpush1.bf16.msra.mxu1 %v3126_v22  ;;  %v3158_v44 = vld [vmem:[#allocation5 + $0x164] ss:$16 sps:$4 sm:$0xff]   ;;  %v3162_v49 = vld [vmem:[#allocation5 + $0x160] ss:$16 sps:$4 sm:$0xff]  }
  0x62   :  { %1723 = vmatpush1.bf16.msra.mxu0 %v3127_v23  ;;  %1683 = vmatprep.subr.bf16.mxu1 %v3128_v24  ;;  %v3160_v45 = vld [vmem:[#allocation5 + $0x364] ss:$16 sps:$4 sm:$0xff]   ;;  %v3163_v50 = vld [vmem:[#allocation5 + $0x360] ss:$16 sps:$4 sm:$0xff]   ;;  %v3221_v23 = vld [vmem:[#allocation5 + $0x8c] ss:$16 sps:$4 sm:$0xff]  }
  0x63   :  { %1724 = vmatprep.subr.bf16.mxu0 %v3130_v25  ;;  %v81_v46 = vld [vmem:[#allocation2] sm:$0xff]  ;;  %v3219_v25 = vld [vmem:[#allocation5 + $0x88] ss:$16 sps:$4 sm:$0xff]  }
  0x64   :  { %v3813_v47 = vcombine.high %v81_v46, %v81_v46  ;;  %v3164_v52 = vld [vmem:[#allocation5 + $0x184] ss:$16 sps:$4 sm:$0xff]   ;;  %v3168_v54 = vld [vmem:[#allocation5 + $0x180] ss:$16 sps:$4 sm:$0xff]   ;;  %v3819_v6 = vcombine.low %v81_v46, %v81_v46 }
  0x65   :  { %1684 = vmatpush1.bf16.msra.mxu1 %v3132_v26  ;;  %v3166_v53 = vld [vmem:[#allocation5 + $0x384] ss:$16 sps:$4 sm:$0xff]   ;;  %v3169_v55 = vld [vmem:[#allocation5 + $0x380] ss:$16 sps:$4 sm:$0xff]  }
  0x66   :  { %1725 = vmatpush1.bf16.msra.mxu0 %v3133_v27  ;;  %1685 = vmatprep.subr.bf16.mxu1 %v3134_v28  ;;  %v3170_v56 = vld [vmem:[#allocation5 + $0x1a4] ss:$16 sps:$4 sm:$0xff]   ;;  %v3174_v58 = vld [vmem:[#allocation5 + $0x1a0] ss:$16 sps:$4 sm:$0xff]   ;;  %v3227_v27 = vld [vmem:[#allocation5 + $0xac] ss:$16 sps:$4 sm:$0xff]  }
  0x67   :  { %1726 = vmatprep.subr.bf16.mxu0 %v3136_v29  ;;  %1703 = vmatprep.mubr.bf16.mxu1 %v3813_v47  ;;  %v3172_v57 = vld [vmem:[#allocation5 + $0x3a4] ss:$16 sps:$4 sm:$0xff]   ;;  %v3175_v59 = vld [vmem:[#allocation5 + $0x3a0] ss:$16 sps:$4 sm:$0xff]   ;;  %v3225_v29 = vld [vmem:[#allocation5 + $0xa8] ss:$16 sps:$4 sm:$0xff]  }
  0x68   :  { %v3176_v60 = vld [vmem:[#allocation5 + $0x1c4] ss:$16 sps:$4 sm:$0xff]   ;;  %v3180_v62 = vld [vmem:[#allocation5 + $0x1c0] ss:$16 sps:$4 sm:$0xff]  }
  0x69   :  { %1686 = vmatpush1.bf16.msra.mxu1 %v3138_v30  ;;  %v3178_v61 = vld [vmem:[#allocation5 + $0x3c4] ss:$16 sps:$4 sm:$0xff]   ;;  %v3181_v63 = vld [vmem:[#allocation5 + $0x3c0] ss:$16 sps:$4 sm:$0xff]  }
  0x6a   :  { %1727 = vmatpush1.bf16.msra.mxu0 %v3139_v31  ;;  %1687 = vmatprep.subr.bf16.mxu1 %v3140_v32  ;;  %v3182_v0 = vld [vmem:[#allocation5 + $0x1e4] ss:$16 sps:$4 sm:$0xff]   ;;  %v3186_v2 = vld [vmem:[#allocation5 + $0x1e0] ss:$16 sps:$4 sm:$0xff]   ;;  %v3233_v31 = vld [vmem:[#allocation5 + $0xcc] ss:$16 sps:$4 sm:$0xff]  }
  0x6b   :  { %1728 = vmatprep.subr.bf16.mxu0 %v3142_v33  ;;  %v3184_v1 = vld [vmem:[#allocation5 + $0x3e4] ss:$16 sps:$4 sm:$0xff]   ;;  %v3187_v3 = vld [vmem:[#allocation5 + $0x3e0] ss:$16 sps:$4 sm:$0xff]  }
  0x6c   :  { %v3194_v4 = vld [vmem:[#allocation5 + $0x404] ss:$16 sps:$4 sm:$0xff]   ;;  %v3192_v8 = vld [vmem:[#allocation5 + $0x400] ss:$16 sps:$4 sm:$0xff]  }
  0x6d   :  { %1688 = vmatpush1.bf16.msra.mxu1 %v3144_v34  ;;  %v3200_v10 = vld [vmem:[#allocation5 + $0x424] ss:$16 sps:$4 sm:$0xff]   ;;  %v3198_v12 = vld [vmem:[#allocation5 + $0x420] ss:$16 sps:$4 sm:$0xff]  }
  0x6e   :  { %1729 = vmatpush1.bf16.msra.mxu0 %v3145_v35  ;;  %1689 = vmatprep.subr.bf16.mxu1 %v3146_v36  ;;  %v3206_v14 = vld [vmem:[#allocation5 + $0x444] ss:$16 sps:$4 sm:$0xff]   ;;  %v3204_v16 = vld [vmem:[#allocation5 + $0x440] ss:$16 sps:$4 sm:$0xff]   ;;  %v3231_v35 = vld [vmem:[#allocation5 + $0xc8] ss:$16 sps:$4 sm:$0xff]  }
  0x6f   :  { %1730 = vmatprep.subr.bf16.mxu0 %v3148_v37  ;;  %v3212_v18 = vld [vmem:[#allocation5 + $0x464] ss:$16 sps:$4 sm:$0xff]   ;;  %v3210_v20 = vld [vmem:[#allocation5 + $0x460] ss:$16 sps:$4 sm:$0xff]   ;;  %v3239_v37 = vld [vmem:[#allocation5 + $0xec] ss:$16 sps:$4 sm:$0xff]  }
  0x70   :  { %v3218_v22 = vld [vmem:[#allocation5 + $0x484] ss:$16 sps:$4 sm:$0xff]   ;;  %v3216_v24 = vld [vmem:[#allocation5 + $0x480] ss:$16 sps:$4 sm:$0xff]  }
  0x71   :  { %1690 = vmatpush1.bf16.msra.mxu1 %v3150_v38  ;;  %v3224_v26 = vld [vmem:[#allocation5 + $0x4a4] ss:$16 sps:$4 sm:$0xff]   ;;  %v3222_v28 = vld [vmem:[#allocation5 + $0x4a0] ss:$16 sps:$4 sm:$0xff]  }
  0x72   :  { %1731 = vmatpush1.bf16.msra.mxu0 %v3151_v39  ;;  %1691 = vmatprep.subr.bf16.mxu1 %v3152_v40  ;;  %v3230_v30 = vld [vmem:[#allocation5 + $0x4c4] ss:$16 sps:$4 sm:$0xff]   ;;  %v3228_v33 = vld [vmem:[#allocation5 + $0x4c0] ss:$16 sps:$4 sm:$0xff]   ;;  %v3237_v39 = vld [vmem:[#allocation5 + $0xe8] ss:$16 sps:$4 sm:$0xff]  }
  0x73   :  { %1732 = vmatprep.subr.bf16.mxu0 %v3154_v41  ;;  %v3826_v32 = vld [vmem:[#allocation2 + $0x10] sm:$0xff]  ;;  %v3245_v41 = vld [vmem:[#allocation5 + $0x10c] ss:$16 sps:$4 sm:$0xff]  }
  0x74   :  { %v3830_v34 = vcombine.high %v3826_v32, %v3826_v32  ;;  %v3236_v36 = vld [vmem:[#allocation5 + $0x4e4] ss:$16 sps:$4 sm:$0xff]   ;;  %v3234_v38 = vld [vmem:[#allocation5 + $0x4e0] ss:$16 sps:$4 sm:$0xff]  }
  0x75   :  { %1692 = vmatpush1.bf16.msra.mxu1 %v3156_v42  ;;  %v3242_v40 = vld [vmem:[#allocation5 + $0x504] ss:$16 sps:$4 sm:$0xff]   ;;  %v3240_v42 = vld [vmem:[#allocation5 + $0x500] ss:$16 sps:$4 sm:$0xff]  }
  0x76   :  { %1733 = vmatpush1.bf16.msra.mxu0 %v3157_v43  ;;  %1693 = vmatprep.subr.bf16.mxu1 %v3158_v44  ;;  %v3243_v43 = vld [vmem:[#allocation5 + $0x108] ss:$16 sps:$4 sm:$0xff]   ;;  %v3248_v44 = vld [vmem:[#allocation5 + $0x524] ss:$16 sps:$4 sm:$0xff]   ;;  %v3246_v46 = vld [vmem:[#allocation5 + $0x520] ss:$16 sps:$4 sm:$0xff]  }
  0x77   :  { %1734 = vmatprep.subr.bf16.mxu0 %v3160_v45  ;;  %v3251_v45 = vld [vmem:[#allocation5 + $0x12c] ss:$16 sps:$4 sm:$0xff]   ;;  %v3254_v48 = vld [vmem:[#allocation5 + $0x544] ss:$16 sps:$4 sm:$0xff]  }
  0x79   :  { %1694 = vmatpush1.bf16.msra.mxu1 %v3162_v49  ;;  %v3257_v49 = vld [vmem:[#allocation5 + $0x14c] ss:$16 sps:$4 sm:$0xff]  }
  0x7a   :  { %1735 = vmatpush1.bf16.msra.mxu0 %v3163_v50  ;;  %1695 = vmatprep.subr.bf16.mxu1 %v3164_v52  ;;  %v3252_v50 = vld [vmem:[#allocation5 + $0x540] ss:$16 sps:$4 sm:$0xff]   ;;  %v3255_v52 = vld [vmem:[#allocation5 + $0x148] ss:$16 sps:$4 sm:$0xff]  }
  0x7b   :  { %1736 = vmatprep.subr.bf16.mxu0 %v3166_v53  ;;  %v3260_v53 = vld [vmem:[#allocation5 + $0x564] ss:$16 sps:$4 sm:$0xff]  }
  0x7d   :  { %1696 = vmatpush1.bf16.msra.mxu1 %v3168_v54  ;;  %v3263_v54 = vld [vmem:[#allocation5 + $0x16c] ss:$16 sps:$4 sm:$0xff]  }
  0x7e   :  { %1737 = vmatpush1.bf16.msra.mxu0 %v3169_v55  ;;  %1697 = vmatprep.subr.bf16.mxu1 %v3170_v56  ;;  %v3258_v55 = vld [vmem:[#allocation5 + $0x560] ss:$16 sps:$4 sm:$0xff]   ;;  %v3261_v56 = vld [vmem:[#allocation5 + $0x168] ss:$16 sps:$4 sm:$0xff]  }
  0x7f   :  { %1738 = vmatprep.subr.bf16.mxu0 %v3172_v57  ;;  %v3266_v57 = vld [vmem:[#allocation5 + $0x584] ss:$16 sps:$4 sm:$0xff]  }
  0x81   :  { %1698 = vmatpush1.bf16.msra.mxu1 %v3174_v58  ;;  %v3269_v58 = vld [vmem:[#allocation5 + $0x18c] ss:$16 sps:$4 sm:$0xff]  }
  0x82   :  { %1739 = vmatpush1.bf16.msra.mxu0 %v3175_v59  ;;  %1699 = vmatprep.subr.bf16.mxu1 %v3176_v60  ;;  %v3264_v59 = vld [vmem:[#allocation5 + $0x580] ss:$16 sps:$4 sm:$0xff]   ;;  %v3267_v60 = vld [vmem:[#allocation5 + $0x188] ss:$16 sps:$4 sm:$0xff]  }
  0x83   :  { %1740 = vmatprep.subr.bf16.mxu0 %v3178_v61  ;;  %v3272_v61 = vld [vmem:[#allocation5 + $0x5a4] ss:$16 sps:$4 sm:$0xff]  }
  0x85   :  { %1700 = vmatpush1.bf16.msra.mxu1 %v3180_v62  ;;  %v3275_v62 = vld [vmem:[#allocation5 + $0x1ac] ss:$16 sps:$4 sm:$0xff]  }
  0x86   :  { %1741 = vmatpush1.bf16.msra.mxu0 %v3181_v63  ;;  %1701 = vmatprep.subr.bf16.mxu1 %v3182_v0  ;;  %v3270_v63 = vld [vmem:[#allocation5 + $0x5a0] ss:$16 sps:$4 sm:$0xff]   ;;  %v3273_v0 = vld [vmem:[#allocation5 + $0x1a8] ss:$16 sps:$4 sm:$0xff]  }
  0x87   :  { %1742 = vmatprep.subr.bf16.mxu0 %v3184_v1  ;;  %v3278_v1 = vld [vmem:[#allocation5 + $0x5c4] ss:$16 sps:$4 sm:$0xff]  }
  0x89   :  { %1702 = vmatpush1.bf16.msra.mxu1 %v3186_v2  ;;  %v3281_v2 = vld [vmem:[#allocation5 + $0x1cc] ss:$16 sps:$4 sm:$0xff]  }
  0x8a   :  { %1743 = vmatpush1.bf16.msra.mxu0 %v3187_v3  ;;  %1835 = vmatprep.subr.bf16.mxu1 %v3197_v5  ;;  %v3276_v3 = vld [vmem:[#allocation5 + $0x5c0] ss:$16 sps:$4 sm:$0xff]   ;;  %v3284_v5 = vld [vmem:[#allocation5 + $0x5e4] ss:$16 sps:$4 sm:$0xff]  }
  0x8b   :  { %1753 = vmatprep.subr.bf16.mxu0 %v3194_v4  ;;  %v3279_v4 = vld [vmem:[#allocation5 + $0x1c8] ss:$16 sps:$4 sm:$0xff]  }
  0x8c   :  { %1704 = vmatmul.mubr.bf16.vlgmr.msra.gmra.mrb[0].mxu1 %v3819_v6 }
  0x8d   :  { %1745 = vmatmul.mubr.bf16.vlgmr.msra.gmra.mrb[0].mxu0 %v3821_v7  ;;  %1836 = vmatpush1.bf16.msra.mxu1 %v3195_v9  ;;  %v3282_v9 = vld [vmem:[#allocation5 + $0x5e0] ss:$16 sps:$4 sm:$0xff]  }
  0x8e   :  { %1754 = vmatpush1.bf16.msra.mxu0 %v3192_v8  ;;  %1837 = vmatprep.subr.bf16.mxu1 %v3203_v11  ;;  %v3287_v8 = vld [vmem:[#allocation5 + $0x1ec] ss:$16 sps:$4 sm:$0xff]   ;;  %v3292_v11 = vld [vmem:[#allocation5 + $0x604] ss:$16 sps:$4 sm:$0xff]  }
  0x8f   :  { %1755 = vmatprep.subr.bf16.mxu0 %v3200_v10  ;;  %1867 = vmatprep.mubr.bf16.mxu1 %v3813_v47  ;;  %v3249_v47 = vld [vmem:[#allocation5 + $0x128] ss:$16 sps:$4 sm:$0xff]  }
  0x90   :  { %1785 = vmatprep.mubr.bf16.mxu0 %v3830_v34  ;;  %v3285_v10 = vld [vmem:[#allocation5 + $0x1e8] ss:$16 sps:$4 sm:$0xff]  }
  0x91   :  { %1838 = vmatpush1.bf16.msra.mxu1 %v3201_v13  ;;  %v3835_v13 = vcombine.low %v3826_v32, %v3826_v32  ;;  %v3317_v32 = vld [vmem:[#allocation5 + $0x288] ss:$16 sps:$4 sm:$0xff]  }
  0x92   :  { %1756 = vmatpush1.bf16.msra.mxu0 %v3198_v12  ;;  %1839 = vmatprep.subr.bf16.mxu1 %v3209_v15  ;;  %v3295_v12 = vld [vmem:[#allocation5 + $0x20c] ss:$16 sps:$4 sm:$0xff]   ;;  %v3293_v15 = vld [vmem:[#allocation5 + $0x208] ss:$16 sps:$4 sm:$0xff]  }
  0x93   :  { %1757 = vmatprep.subr.bf16.mxu0 %v3206_v14  ;;  %v3290_v14 = vld [vmem:[#allocation5 + $0x600] ss:$16 sps:$4 sm:$0xff]  }
  0x95   :  { %1840 = vmatpush1.bf16.msra.mxu1 %v3207_v17  ;;  %v3301_v17 = vld [vmem:[#allocation5 + $0x22c] ss:$16 sps:$4 sm:$0xff]  }
  0x96   :  { %1758 = vmatpush1.bf16.msra.mxu0 %v3204_v16  ;;  %1841 = vmatprep.subr.bf16.mxu1 %v3215_v19  ;;  %v3298_v16 = vld [vmem:[#allocation5 + $0x624] ss:$16 sps:$4 sm:$0xff]  }
  0x97   :  { %1759 = vmatprep.subr.bf16.mxu0 %v3212_v18  ;;  %v3837_v18 = vld [vmem:[#allocation2 + $0x18] sm:$0xff] }
  0x98   :  { %v3841_v19 = vcombine.high %v3837_v18, %v3837_v18 }
  0x99   :  { %1842 = vmatpush1.bf16.msra.mxu1 %v3213_v21  ;;  %v3299_v21 = vld [vmem:[#allocation5 + $0x228] ss:$16 sps:$4 sm:$0xff]  }
  0x9a   :  { %1760 = vmatpush1.bf16.msra.mxu0 %v3210_v20  ;;  %1843 = vmatprep.subr.bf16.mxu1 %v3221_v23  ;;  %v3296_v20 = vld [vmem:[#allocation5 + $0x620] ss:$16 sps:$4 sm:$0xff]   ;;  %v3307_v23 = vld [vmem:[#allocation5 + $0x24c] ss:$16 sps:$4 sm:$0xff]  }
  0x9b   :  { %1761 = vmatprep.subr.bf16.mxu0 %v3218_v22  ;;  %v3304_v22 = vld [vmem:[#allocation5 + $0x644] ss:$16 sps:$4 sm:$0xff]  }
  0x9d   :  { %1844 = vmatpush1.bf16.msra.mxu1 %v3219_v25  ;;  %v3305_v25 = vld [vmem:[#allocation5 + $0x248] ss:$16 sps:$4 sm:$0xff]  }
  0x9e   :  { %1762 = vmatpush1.bf16.msra.mxu0 %v3216_v24  ;;  %1845 = vmatprep.subr.bf16.mxu1 %v3227_v27  ;;  %v3302_v24 = vld [vmem:[#allocation5 + $0x640] ss:$16 sps:$4 sm:$0xff]  }
  0x9f   :  { %1763 = vmatprep.subr.bf16.mxu0 %v3224_v26  ;;  %v3310_v26 = vld [vmem:[#allocation5 + $0x664] ss:$16 sps:$4 sm:$0xff]   ;;  %v3308_v27 = vld [vmem:[#allocation5 + $0x660] ss:$16 sps:$4 sm:$0xff]  }
  0xa1   :  { %1846 = vmatpush1.bf16.msra.mxu1 %v3225_v29  ;;  %v3316_v29 = vld [vmem:[#allocation5 + $0x684] ss:$16 sps:$4 sm:$0xff]  }
  0xa2   :  { %1764 = vmatpush1.bf16.msra.mxu0 %v3222_v28  ;;  %1847 = vmatprep.subr.bf16.mxu1 %v3233_v31  ;;  %v3311_v28 = vld [vmem:[#allocation5 + $0x268] ss:$16 sps:$4 sm:$0xff]   ;;  %v3314_v31 = vld [vmem:[#allocation5 + $0x680] ss:$16 sps:$4 sm:$0xff]  }
  0xa3   :  { %1765 = vmatprep.subr.bf16.mxu0 %v3230_v30  ;;  %v3319_v30 = vld [vmem:[#allocation5 + $0x28c] ss:$16 sps:$4 sm:$0xff]  }
  0xa5   :  { %1848 = vmatpush1.bf16.msra.mxu1 %v3231_v35  ;;  %v3320_v35 = vld [vmem:[#allocation5 + $0x6a0] ss:$16 sps:$4 sm:$0xff]  }
  0xa6   :  { %1766 = vmatpush1.bf16.msra.mxu0 %v3228_v33  ;;  %1849 = vmatprep.subr.bf16.mxu1 %v3239_v37  ;;  %v3325_v33 = vld [vmem:[#allocation5 + $0x2ac] ss:$16 sps:$4 sm:$0xff]   ;;  %v3328_v37 = vld [vmem:[#allocation5 + $0x6c4] ss:$16 sps:$4 sm:$0xff]  }
  0xa7   :  { %1767 = vmatprep.subr.bf16.mxu0 %v3236_v36  ;;  %v3323_v36 = vld [vmem:[#allocation5 + $0x2a8] ss:$16 sps:$4 sm:$0xff]  }
  0xa9   :  { %1850 = vmatpush1.bf16.msra.mxu1 %v3237_v39  ;;  %v3326_v39 = vld [vmem:[#allocation5 + $0x6c0] ss:$16 sps:$4 sm:$0xff]  }
  0xaa   :  { %1768 = vmatpush1.bf16.msra.mxu0 %v3234_v38  ;;  %1851 = vmatprep.subr.bf16.mxu1 %v3245_v41  ;;  %v3331_v38 = vld [vmem:[#allocation5 + $0x2cc] ss:$16 sps:$4 sm:$0xff]   ;;  %v3334_v41 = vld [vmem:[#allocation5 + $0x6e4] ss:$16 sps:$4 sm:$0xff]  }
  0xab   :  { %1769 = vmatprep.subr.bf16.mxu0 %v3242_v40  ;;  %v3329_v40 = vld [vmem:[#allocation5 + $0x2c8] ss:$16 sps:$4 sm:$0xff]  }
  0xad   :  { %1852 = vmatpush1.bf16.msra.mxu1 %v3243_v43  ;;  %v3332_v43 = vld [vmem:[#allocation5 + $0x6e0] ss:$16 sps:$4 sm:$0xff]  }
  0xae   :  { %1770 = vmatpush1.bf16.msra.mxu0 %v3240_v42  ;;  %1853 = vmatprep.subr.bf16.mxu1 %v3251_v45  ;;  %v3337_v42 = vld [vmem:[#allocation5 + $0x2ec] ss:$16 sps:$4 sm:$0xff]   ;;  %v3340_v45 = vld [vmem:[#allocation5 + $0x704] ss:$16 sps:$4 sm:$0xff]  }
  0xaf   :  { %1771 = vmatprep.subr.bf16.mxu0 %v3248_v44  ;;  %v3335_v44 = vld [vmem:[#allocation5 + $0x2e8] ss:$16 sps:$4 sm:$0xff]  }
  0xb1   :  { %1854 = vmatpush1.bf16.msra.mxu1 %v3249_v47  ;;  %v3338_v47 = vld [vmem:[#allocation5 + $0x700] ss:$16 sps:$4 sm:$0xff]  }
  0xb2   :  { %1772 = vmatpush1.bf16.msra.mxu0 %v3246_v46  ;;  %1855 = vmatprep.subr.bf16.mxu1 %v3257_v49  ;;  %v3343_v46 = vld [vmem:[#allocation5 + $0x30c] ss:$16 sps:$4 sm:$0xff]   ;;  %v3346_v49 = vld [vmem:[#allocation5 + $0x724] ss:$16 sps:$4 sm:$0xff]  }
  0xb3   :  { %1773 = vmatprep.subr.bf16.mxu0 %v3254_v48  ;;  %v3341_v48 = vld [vmem:[#allocation5 + $0x308] ss:$16 sps:$4 sm:$0xff]  }
  0xb5   :  { %1856 = vmatpush1.bf16.msra.mxu1 %v3255_v52  ;;  %v3344_v52 = vld [vmem:[#allocation5 + $0x720] ss:$16 sps:$4 sm:$0xff]  }
  0xb6   :  { %1774 = vmatpush1.bf16.msra.mxu0 %v3252_v50  ;;  %1857 = vmatprep.subr.bf16.mxu1 %v3263_v54  ;;  %v3349_v50 = vld [vmem:[#allocation5 + $0x32c] ss:$16 sps:$4 sm:$0xff]   ;;  %v3352_v54 = vld [vmem:[#allocation5 + $0x744] ss:$16 sps:$4 sm:$0xff]  }
  0xb7   :  { %1775 = vmatprep.subr.bf16.mxu0 %v3260_v53  ;;  %v3347_v53 = vld [vmem:[#allocation5 + $0x328] ss:$16 sps:$4 sm:$0xff]  }
  0xb9   :  { %1858 = vmatpush1.bf16.msra.mxu1 %v3261_v56  ;;  %v3350_v56 = vld [vmem:[#allocation5 + $0x740] ss:$16 sps:$4 sm:$0xff]  }
  0xba   :  { %1776 = vmatpush1.bf16.msra.mxu0 %v3258_v55  ;;  %1859 = vmatprep.subr.bf16.mxu1 %v3269_v58  ;;  %v3355_v55 = vld [vmem:[#allocation5 + $0x34c] ss:$16 sps:$4 sm:$0xff]   ;;  %v3358_v58 = vld [vmem:[#allocation5 + $0x764] ss:$16 sps:$4 sm:$0xff]  }
  0xbb   :  { %1777 = vmatprep.subr.bf16.mxu0 %v3266_v57  ;;  %v3353_v57 = vld [vmem:[#allocation5 + $0x348] ss:$16 sps:$4 sm:$0xff]  }
  0xbd   :  { %1860 = vmatpush1.bf16.msra.mxu1 %v3267_v60  ;;  %v3356_v60 = vld [vmem:[#allocation5 + $0x760] ss:$16 sps:$4 sm:$0xff]  }
  0xbe   :  { %1778 = vmatpush1.bf16.msra.mxu0 %v3264_v59  ;;  %1861 = vmatprep.subr.bf16.mxu1 %v3275_v62  ;;  %v3361_v59 = vld [vmem:[#allocation5 + $0x36c] ss:$16 sps:$4 sm:$0xff]   ;;  %v3364_v62 = vld [vmem:[#allocation5 + $0x784] ss:$16 sps:$4 sm:$0xff]  }
  0xbf   :  { %1779 = vmatprep.subr.bf16.mxu0 %v3272_v61  ;;  %v3359_v61 = vld [vmem:[#allocation5 + $0x368] ss:$16 sps:$4 sm:$0xff]  }
  0xc1   :  { %1862 = vmatpush1.bf16.msra.mxu1 %v3273_v0  ;;  %v3362_v0 = vld [vmem:[#allocation5 + $0x780] ss:$16 sps:$4 sm:$0xff]  }
  0xc2   :  { %1780 = vmatpush1.bf16.msra.mxu0 %v3270_v63  ;;  %1863 = vmatprep.subr.bf16.mxu1 %v3281_v2  ;;  %v3367_v63 = vld [vmem:[#allocation5 + $0x38c] ss:$16 sps:$4 sm:$0xff]   ;;  %v3370_v2 = vld [vmem:[#allocation5 + $0x7a4] ss:$16 sps:$4 sm:$0xff]  }
  0xc3   :  { %1781 = vmatprep.subr.bf16.mxu0 %v3278_v1  ;;  %v3365_v1 = vld [vmem:[#allocation5 + $0x388] ss:$16 sps:$4 sm:$0xff]  }
  0xc5   :  { %1864 = vmatpush1.bf16.msra.mxu1 %v3279_v4  ;;  %v3368_v4 = vld [vmem:[#allocation5 + $0x7a0] ss:$16 sps:$4 sm:$0xff]  }
  0xc6   :  { %1782 = vmatpush1.bf16.msra.mxu0 %v3276_v3  ;;  %1865 = vmatprep.subr.bf16.mxu1 %v3287_v8  ;;  %v3373_v3 = vld [vmem:[#allocation5 + $0x3ac] ss:$16 sps:$4 sm:$0xff]   ;;  %v3376_v8 = vld [vmem:[#allocation5 + $0x7c4] ss:$16 sps:$4 sm:$0xff]  }
  0xc7   :  { %1783 = vmatprep.subr.bf16.mxu0 %v3284_v5  ;;  %v3371_v5 = vld [vmem:[#allocation5 + $0x3a8] ss:$16 sps:$4 sm:$0xff]  }
  0xc9   :  { %1866 = vmatpush1.bf16.msra.mxu1 %v3285_v10  ;;  %v3374_v10 = vld [vmem:[#allocation5 + $0x7c0] ss:$16 sps:$4 sm:$0xff]  }
  0xca   :  { %1784 = vmatpush1.bf16.msra.mxu0 %v3282_v9  ;;  %1876 = vmatprep.subr.bf16.mxu1 %v3295_v12  ;;  %v3379_v9 = vld [vmem:[#allocation5 + $0x3cc] ss:$16 sps:$4 sm:$0xff]   ;;  %v3382_v12 = vld [vmem:[#allocation5 + $0x7e4] ss:$16 sps:$4 sm:$0xff]  }
  0xcb   :  { %1794 = vmatprep.subr.bf16.mxu0 %v3292_v11  ;;  %v3377_v11 = vld [vmem:[#allocation5 + $0x3c8] ss:$16 sps:$4 sm:$0xff]  }
  0xcc   :  { %1868 = vmatmul.mubr.bf16.vlgmr.msra.gmra.mrb[4].mxu1 %v3819_v6  ;;  %v3313_v6 = vld [vmem:[#allocation5 + $0x26c] ss:$16 sps:$4 sm:$0xff]  }
  0xcd   :  { %1786 = vmatmul.mubr.bf16.vlgmr.msra.gmra.mrb[0].mxu0 %v3835_v13  ;;  %1877 = vmatpush1.bf16.msra.mxu1 %v3293_v15  ;;  %v3380_v15 = vld [vmem:[#allocation5 + $0x7e0] ss:$16 sps:$4 sm:$0xff]  }
  0xce   :  { %1795 = vmatpush1.bf16.msra.mxu0 %v3290_v14  ;;  %1878 = vmatprep.subr.bf16.mxu1 %v3301_v17  ;;  %v3385_v14 = vld [vmem:[#allocation5 + $0x3ec] ss:$16 sps:$4 sm:$0xff]  }
  0xcf   :  { %1796 = vmatprep.subr.bf16.mxu0 %v3298_v16  ;;  %1826 = vmatprep.mubr.bf16.mxu0 %v3841_v19  ;;  %v3383_v16 = vld [vmem:[#allocation5 + $0x3e8] ss:$16 sps:$4 sm:$0xff]   ;;  %v3390_v17 = vld [vmem:[#allocation5 + $0x40c] ss:$16 sps:$4 sm:$0xff]  }
  0xd0   :  { %1908 = vmatprep.mubr.bf16.mxu1 %v3815_v51  ;;  %v3322_v51 = vld [vmem:[#allocation5 + $0x6a4] ss:$16 sps:$4 sm:$0xff]  }
  0xd1   :  { %1879 = vmatpush1.bf16.msra.mxu1 %v3299_v21  ;;  %v3849_v21 = vcombine.low %v3837_v18, %v3837_v18  ;;  %v3487_v18 = vld [vmem:[#allocation7 + $0x10] ss:$8 sps:$4 sm:$0xff]  }
  0xd2   :  { %1797 = vmatpush1.bf16.msra.mxu0 %v3296_v20  ;;  %1880 = vmatprep.subr.bf16.mxu1 %v3307_v23  ;;  %v3388_v20 = vld [vmem:[#allocation5 + $0x408] ss:$16 sps:$4 sm:$0xff]  }
  0xd3   :  { %1798 = vmatprep.subr.bf16.mxu0 %v3304_v22  ;;  %v3393_v22 = vld [vmem:[#allocation5 + $0x42c] ss:$16 sps:$4 sm:$0xff]   ;;  %v3484_v23 = vld [vmem:[#allocation7] ss:$8 sps:$4 sm:$0xff]  }
  0xd5   :  { %1881 = vmatpush1.bf16.msra.mxu1 %v3305_v25  ;;  %v3391_v25 = vld [vmem:[#allocation5 + $0x428] ss:$16 sps:$4 sm:$0xff]  }
  0xd6   :  { %1799 = vmatpush1.bf16.msra.mxu0 %v3302_v24  ;;  %1882 = vmatprep.subr.bf16.mxu1 %v3313_v6  ;;  %v3486_v24 = vld [vmem:[#allocation7 + $0x4] ss:$8 sps:$4 sm:$0xff]  }
  0xd7   :  { %1800 = vmatprep.subr.bf16.mxu0 %v3310_v26  ;;  %v3489_v26 = vld [vmem:[#allocation7 + $0x14] ss:$8 sps:$4 sm:$0xff]  }
  0xd8   :  { %v3396_v6 = vld [vmem:[#allocation5 + $0x44c] ss:$16 sps:$4 sm:$0xff]  }
  0xd9   :  { %1883 = vmatpush1.bf16.msra.mxu1 %v3311_v28  ;;  %v3394_v28 = vld [vmem:[#allocation5 + $0x448] ss:$16 sps:$4 sm:$0xff]  }
  0xda   :  { %1801 = vmatpush1.bf16.msra.mxu0 %v3308_v27  ;;  %1884 = vmatprep.subr.bf16.mxu1 %v3319_v30  ;;  %v3492_v27 = vld [vmem:[#allocation7 + $0x24] ss:$8 sps:$4 sm:$0xff]   ;;  %v3397_v30 = vld [vmem:[#allocation5 + $0x468] ss:$16 sps:$4 sm:$0xff]  }
  0xdb   :  { %1802 = vmatprep.subr.bf16.mxu0 %v3316_v29  ;;  %v3399_v29 = vld [vmem:[#allocation5 + $0x46c] ss:$16 sps:$4 sm:$0xff]  }
  0xdd   :  { %1885 = vmatpush1.bf16.msra.mxu1 %v3317_v32  ;;  %v3495_v32 = vld [vmem:[#allocation7 + $0x34] ss:$8 sps:$4 sm:$0xff]  }
  0xde   :  { %1803 = vmatpush1.bf16.msra.mxu0 %v3314_v31  ;;  %1886 = vmatprep.subr.bf16.mxu1 %v3325_v33  ;;  %v3402_v31 = vld [vmem:[#allocation5 + $0x48c] ss:$16 sps:$4 sm:$0xff]   ;;  %v3400_v33 = vld [vmem:[#allocation5 + $0x488] ss:$16 sps:$4 sm:$0xff]  }
  0xdf   :  { %1804 = vmatprep.subr.bf16.mxu0 %v3322_v51  ;;  %v3498_v51 = vld [vmem:[#allocation7 + $0x44] ss:$8 sps:$4 sm:$0xff]  }
  0xe1   :  { %1887 = vmatpush1.bf16.msra.mxu1 %v3323_v36  ;;  %v3496_v36 = vld [vmem:[#allocation7 + $0x40] ss:$8 sps:$4 sm:$0xff]  }
  0xe2   :  { %1805 = vmatpush1.bf16.msra.mxu0 %v3320_v35  ;;  %1888 = vmatprep.subr.bf16.mxu1 %v3331_v38  ;;  %v3405_v35 = vld [vmem:[#allocation5 + $0x4ac] ss:$16 sps:$4 sm:$0xff]   ;;  %v3403_v38 = vld [vmem:[#allocation5 + $0x4a8] ss:$16 sps:$4 sm:$0xff]  }
  0xe3   :  { %1806 = vmatprep.subr.bf16.mxu0 %v3328_v37  ;;  %v3501_v37 = vld [vmem:[#allocation7 + $0x54] ss:$8 sps:$4 sm:$0xff]  }
  0xe5   :  { %1889 = vmatpush1.bf16.msra.mxu1 %v3329_v40  ;;  %v3499_v40 = vld [vmem:[#allocation7 + $0x50] ss:$8 sps:$4 sm:$0xff]  }
  0xe6   :  { %1807 = vmatpush1.bf16.msra.mxu0 %v3326_v39  ;;  %1890 = vmatprep.subr.bf16.mxu1 %v3337_v42  ;;  %v3408_v39 = vld [vmem:[#allocation5 + $0x4cc] ss:$16 sps:$4 sm:$0xff]   ;;  %v3406_v42 = vld [vmem:[#allocation5 + $0x4c8] ss:$16 sps:$4 sm:$0xff]  }
  0xe7   :  { %1808 = vmatprep.subr.bf16.mxu0 %v3334_v41  ;;  %v3504_v41 = vld [vmem:[#allocation7 + $0x64] ss:$8 sps:$4 sm:$0xff]  }
  0xe9   :  { %1891 = vmatpush1.bf16.msra.mxu1 %v3335_v44  ;;  %v3502_v44 = vld [vmem:[#allocation7 + $0x60] ss:$8 sps:$4 sm:$0xff]  }
  0xea   :  { %1809 = vmatpush1.bf16.msra.mxu0 %v3332_v43  ;;  %1892 = vmatprep.subr.bf16.mxu1 %v3343_v46  ;;  %v3411_v43 = vld [vmem:[#allocation5 + $0x4ec] ss:$16 sps:$4 sm:$0xff]   ;;  %v3409_v46 = vld [vmem:[#allocation5 + $0x4e8] ss:$16 sps:$4 sm:$0xff]  }
  0xeb   :  { %1810 = vmatprep.subr.bf16.mxu0 %v3340_v45  ;;  %v3507_v45 = vld [vmem:[#allocation7 + $0x74] ss:$8 sps:$4 sm:$0xff]  }
  0xed   :  { %1893 = vmatpush1.bf16.msra.mxu1 %v3341_v48  ;;  %v3505_v48 = vld [vmem:[#allocation7 + $0x70] ss:$8 sps:$4 sm:$0xff]  }
  0xee   :  { %1811 = vmatpush1.bf16.msra.mxu0 %v3338_v47  ;;  %1894 = vmatprep.subr.bf16.mxu1 %v3349_v50  ;;  %v3414_v47 = vld [vmem:[#allocation5 + $0x50c] ss:$16 sps:$4 sm:$0xff]   ;;  %v3412_v50 = vld [vmem:[#allocation5 + $0x508] ss:$16 sps:$4 sm:$0xff]  }
  0xef   :  { %1812 = vmatprep.subr.bf16.mxu0 %v3346_v49  ;;  %v3510_v49 = vld [vmem:[#allocation7 + $0x84] ss:$8 sps:$4 sm:$0xff]  }
  0xf1   :  { %1895 = vmatpush1.bf16.msra.mxu1 %v3347_v53  ;;  %v3508_v53 = vld [vmem:[#allocation7 + $0x80] ss:$8 sps:$4 sm:$0xff]  }
  0xf2   :  { %1813 = vmatpush1.bf16.msra.mxu0 %v3344_v52  ;;  %1896 = vmatprep.subr.bf16.mxu1 %v3355_v55  ;;  %v3417_v52 = vld [vmem:[#allocation5 + $0x52c] ss:$16 sps:$4 sm:$0xff]   ;;  %v3415_v55 = vld [vmem:[#allocation5 + $0x528] ss:$16 sps:$4 sm:$0xff]  }
  0xf3   :  { %1814 = vmatprep.subr.bf16.mxu0 %v3352_v54  ;;  %v3513_v54 = vld [vmem:[#allocation7 + $0x94] ss:$8 sps:$4 sm:$0xff]  }
  0xf5   :  { %1897 = vmatpush1.bf16.msra.mxu1 %v3353_v57  ;;  %v3511_v57 = vld [vmem:[#allocation7 + $0x90] ss:$8 sps:$4 sm:$0xff]  }
  0xf6   :  { %1815 = vmatpush1.bf16.msra.mxu0 %v3350_v56  ;;  %1898 = vmatprep.subr.bf16.mxu1 %v3361_v59  ;;  %v3420_v56 = vld [vmem:[#allocation5 + $0x54c] ss:$16 sps:$4 sm:$0xff]   ;;  %v3418_v59 = vld [vmem:[#allocation5 + $0x548] ss:$16 sps:$4 sm:$0xff]  }
  0xf7   :  { %1816 = vmatprep.subr.bf16.mxu0 %v3358_v58  ;;  %v3516_v58 = vld [vmem:[#allocation7 + $0xa4] ss:$8 sps:$4 sm:$0xff]  }
  0xf9   :  { %1899 = vmatpush1.bf16.msra.mxu1 %v3359_v61  ;;  %v3514_v61 = vld [vmem:[#allocation7 + $0xa0] ss:$8 sps:$4 sm:$0xff]  }
  0xfa   :  { %1817 = vmatpush1.bf16.msra.mxu0 %v3356_v60  ;;  %1900 = vmatprep.subr.bf16.mxu1 %v3367_v63  ;;  %v3423_v60 = vld [vmem:[#allocation5 + $0x56c] ss:$16 sps:$4 sm:$0xff]   ;;  %v3421_v63 = vld [vmem:[#allocation5 + $0x568] ss:$16 sps:$4 sm:$0xff]  }
  0xfb   :  { %1818 = vmatprep.subr.bf16.mxu0 %v3364_v62  ;;  %v3519_v62 = vld [vmem:[#allocation7 + $0xb4] ss:$8 sps:$4 sm:$0xff]  }
  0xfd   :  { %1901 = vmatpush1.bf16.msra.mxu1 %v3365_v1  ;;  %v3517_v1 = vld [vmem:[#allocation7 + $0xb0] ss:$8 sps:$4 sm:$0xff]  }
  0xfe   :  { %1819 = vmatpush1.bf16.msra.mxu0 %v3362_v0  ;;  %1902 = vmatprep.subr.bf16.mxu1 %v3373_v3  ;;  %v3426_v0 = vld [vmem:[#allocation5 + $0x58c] ss:$16 sps:$4 sm:$0xff]   ;;  %v3424_v3 = vld [vmem:[#allocation5 + $0x588] ss:$16 sps:$4 sm:$0xff]  }
  0xff   :  { %1820 = vmatprep.subr.bf16.mxu0 %v3370_v2  ;;  %v3522_v2 = vld [vmem:[#allocation7 + $0xc4] ss:$8 sps:$4 sm:$0xff]  }
 0x101   :  { %1903 = vmatpush1.bf16.msra.mxu1 %v3371_v5  ;;  %v3520_v5 = vld [vmem:[#allocation7 + $0xc0] ss:$8 sps:$4 sm:$0xff]  }
 0x102   :  { %1821 = vmatpush1.bf16.msra.mxu0 %v3368_v4  ;;  %1904 = vmatprep.subr.bf16.mxu1 %v3379_v9  ;;  %v3429_v4 = vld [vmem:[#allocation5 + $0x5ac] ss:$16 sps:$4 sm:$0xff]   ;;  %v3427_v9 = vld [vmem:[#allocation5 + $0x5a8] ss:$16 sps:$4 sm:$0xff]  }
 0x103   :  { %1822 = vmatprep.subr.bf16.mxu0 %v3376_v8  ;;  %v3525_v8 = vld [vmem:[#allocation7 + $0xd4] ss:$8 sps:$4 sm:$0xff]  }
 0x105   :  { %1905 = vmatpush1.bf16.msra.mxu1 %v3377_v11  ;;  %v3523_v11 = vld [vmem:[#allocation7 + $0xd0] ss:$8 sps:$4 sm:$0xff]  }
 0x106   :  { %1823 = vmatpush1.bf16.msra.mxu0 %v3374_v10  ;;  %1906 = vmatprep.subr.bf16.mxu1 %v3385_v14  ;;  %v3432_v10 = vld [vmem:[#allocation5 + $0x5cc] ss:$16 sps:$4 sm:$0xff]  }
 0x107   :  { %1824 = vmatprep.subr.bf16.mxu0 %v3382_v12  ;;  %v3430_v12 = vld [vmem:[#allocation5 + $0x5c8] ss:$16 sps:$4 sm:$0xff]   ;;  %v3435_v14 = vld [vmem:[#allocation5 + $0x5ec] ss:$16 sps:$4 sm:$0xff]  }
 0x109   :  { %1907 = vmatpush1.bf16.msra.mxu1 %v3383_v16  ;;  %v3438_v16 = vld [vmem:[#allocation5 + $0x60c] ss:$16 sps:$4 sm:$0xff]  }
 0x10a   :  { %1825 = vmatpush1.bf16.msra.mxu0 %v3380_v15  ;;  %1917 = vmatprep.subr.bf16.mxu1 %v3390_v17  ;;  %v3433_v15 = vld [vmem:[#allocation5 + $0x5e8] ss:$16 sps:$4 sm:$0xff]  }
 0x10b   :  { %2403 = vmatprep.subr.bf16.mxu0 %v3486_v24  ;;  %v3436_v17 = vld [vmem:[#allocation5 + $0x608] ss:$16 sps:$4 sm:$0xff]  }
 0x10c   :  { %1909 = vmatmul.mubr.bf16.vlgmr.msra.gmra.mrb[4].mxu1 %v3821_v7  ;;  %v3490_v7 = vld [vmem:[#allocation7 + $0x20] ss:$8 sps:$4 sm:$0xff]  }
 0x10d   :  { %1827 = vmatmul.mubr.bf16.vlgmr.msra.gmra.mrb[0].mxu0 %v3849_v21  ;;  %1918 = vmatpush1.bf16.msra.mxu1 %v3388_v20  ;;  %v3441_v20 = vld [vmem:[#allocation5 + $0x62c] ss:$16 sps:$4 sm:$0xff]   ;;  %v3442_v24 = vld [vmem:[#allocation5 + $0x648] ss:$16 sps:$4 sm:$0xff]  }
 0x10e   :  { %1949 = vmatprep.mubr.bf16.mxu1 %v3830_v34  ;;  %1919 = vmatprep.subr.bf16.mxu1 %v3393_v22  ;;  %v3493_v34 = vld [vmem:[#allocation7 + $0x30] ss:$8 sps:$4 sm:$0xff]  }
 0x10f   :  { %2404 = vmatpush1.bf16.msra.mxu0 %v3484_v23  ;;  %v3439_v22 = vld [vmem:[#allocation5 + $0x628] ss:$16 sps:$4 sm:$0xff]   ;;  %v3444_v23 = vld [vmem:[#allocation5 + $0x64c] ss:$16 sps:$4 sm:$0xff]  }
 0x110   :  { %2405 = vmatprep.subr.bf16.mxu0 %v3489_v26  ;;  %v3445_v26 = vld [vmem:[#allocation5 + $0x668] ss:$16 sps:$4 sm:$0xff]  }
 0x111   :  { %1920 = vmatpush1.bf16.msra.mxu1 %v3391_v25  ;;  %v3447_v25 = vld [vmem:[#allocation5 + $0x66c] ss:$16 sps:$4 sm:$0xff]  }
 0x112   :  { %1921 = vmatprep.subr.bf16.mxu1 %v3396_v6  ;;  %v3450_v6 = vld [vmem:[#allocation5 + $0x68c] ss:$16 sps:$4 sm:$0xff]  }
 0x113   :  { %2406 = vmatpush1.bf16.msra.mxu0 %v3487_v18  ;;  %v3448_v18 = vld [vmem:[#allocation5 + $0x688] ss:$16 sps:$4 sm:$0xff]  }
 0x114   :  { %2407 = vmatprep.subr.bf16.mxu0 %v3492_v27  ;;  %v3453_v27 = vld [vmem:[#allocation5 + $0x6ac] ss:$16 sps:$4 sm:$0xff]  }
 0x115   :  { %1922 = vmatpush1.bf16.msra.mxu1 %v3394_v28  ;;  %v3456_v28 = vld [vmem:[#allocation5 + $0x6cc] ss:$16 sps:$4 sm:$0xff]  }
 0x116   :  { %1923 = vmatprep.subr.bf16.mxu1 %v3399_v29  ;;  %v3528_v29 = vld [vmem:[#allocation7 + $0xe4] ss:$8 sps:$4 sm:$0xff]  }
 0x117   :  { %2408 = vmatpush1.bf16.msra.mxu0 %v3490_v7  ;;  %v3526_v7 = vld [vmem:[#allocation7 + $0xe0] ss:$8 sps:$4 sm:$0xff]  }
 0x118   :  { %2409 = vmatprep.subr.bf16.mxu0 %v3495_v32  ;;  %v3454_v32 = vld [vmem:[#allocation5 + $0x6c8] ss:$16 sps:$4 sm:$0xff]  }
 0x119   :  { %1924 = vmatpush1.bf16.msra.mxu1 %v3397_v30 }
 0x11a   :  { %1925 = vmatprep.subr.bf16.mxu1 %v3402_v31 }
 0x11b   :  { %2410 = vmatpush1.bf16.msra.mxu0 %v3493_v34 }
 0x11c   :  { %2411 = vmatprep.subr.bf16.mxu0 %v3498_v51  ;;  %v3459_v51 = vld [vmem:[#allocation5 + $0x6ec] ss:$16 sps:$4 sm:$0xff]  }
 0x11d   :  { %1926 = vmatpush1.bf16.msra.mxu1 %v3400_v33  ;;  %v3531_v33 = vld [vmem:[#allocation7 + $0xf4] ss:$8 sps:$4 sm:$0xff]  }
 0x11e   :  { %1927 = vmatprep.subr.bf16.mxu1 %v3405_v35  ;;  %v3529_v35 = vld [vmem:[#allocation7 + $0xf0] ss:$8 sps:$4 sm:$0xff]  }
 0x11f   :  { %2412 = vmatpush1.bf16.msra.mxu0 %v3496_v36  ;;  %v3457_v36 = vld [vmem:[#allocation5 + $0x6e8] ss:$16 sps:$4 sm:$0xff]  }
 0x120   :  { %2413 = vmatprep.subr.bf16.mxu0 %v3501_v37  ;;  %v3462_v37 = vld [vmem:[#allocation5 + $0x70c] ss:$16 sps:$4 sm:$0xff]  }
 0x121   :  { %1928 = vmatpush1.bf16.msra.mxu1 %v3403_v38  ;;  %v3534_v38 = vld [vmem:[#allocation7 + $0x104] ss:$8 sps:$4 sm:$0xff]  }
 0x122   :  { %1929 = vmatprep.subr.bf16.mxu1 %v3408_v39  ;;  %v3460_v39 = vld [vmem:[#allocation5 + $0x708] ss:$16 sps:$4 sm:$0xff]  }
 0x123   :  { %2414 = vmatpush1.bf16.msra.mxu0 %v3499_v40  ;;  %v3465_v40 = vld [vmem:[#allocation5 + $0x72c] ss:$16 sps:$4 sm:$0xff]  }
 0x124   :  { %2415 = vmatprep.subr.bf16.mxu0 %v3504_v41  ;;  %v3463_v41 = vld [vmem:[#allocation5 + $0x728] ss:$16 sps:$4 sm:$0xff]  }
 0x125   :  { %1930 = vmatpush1.bf16.msra.mxu1 %v3406_v42  ;;  %v3468_v42 = vld [vmem:[#allocation5 + $0x74c] ss:$16 sps:$4 sm:$0xff]  }
 0x126   :  { %1931 = vmatprep.subr.bf16.mxu1 %v3411_v43  ;;  %v3466_v43 = vld [vmem:[#allocation5 + $0x748] ss:$16 sps:$4 sm:$0xff]  }
 0x127   :  { %2416 = vmatpush1.bf16.msra.mxu0 %v3502_v44  ;;  %v3471_v44 = vld [vmem:[#allocation5 + $0x76c] ss:$16 sps:$4 sm:$0xff]  }
 0x128   :  { %2417 = vmatprep.subr.bf16.mxu0 %v3507_v45  ;;  %v3469_v45 = vld [vmem:[#allocation5 + $0x768] ss:$16 sps:$4 sm:$0xff]  }
 0x129   :  { %1932 = vmatpush1.bf16.msra.mxu1 %v3409_v46  ;;  %v3474_v46 = vld [vmem:[#allocation5 + $0x78c] ss:$16 sps:$4 sm:$0xff]  }
 0x12a   :  { %1933 = vmatprep.subr.bf16.mxu1 %v3414_v47  ;;  %v3472_v47 = vld [vmem:[#allocation5 + $0x788] ss:$16 sps:$4 sm:$0xff]  }
 0x12b   :  { %2418 = vmatpush1.bf16.msra.mxu0 %v3505_v48  ;;  %v3477_v48 = vld [vmem:[#allocation5 + $0x7ac] ss:$16 sps:$4 sm:$0xff]  }
 0x12c   :  { %2419 = vmatprep.subr.bf16.mxu0 %v3510_v49  ;;  %v3475_v49 = vld [vmem:[#allocation5 + $0x7a8] ss:$16 sps:$4 sm:$0xff]  }
 0x12d   :  { %1934 = vmatpush1.bf16.msra.mxu1 %v3412_v50  ;;  %v3480_v50 = vld [vmem:[#allocation5 + $0x7cc] ss:$16 sps:$4 sm:$0xff]  }
 0x12e   :  { %1935 = vmatprep.subr.bf16.mxu1 %v3417_v52  ;;  %v3478_v52 = vld [vmem:[#allocation5 + $0x7c8] ss:$16 sps:$4 sm:$0xff]  }
 0x12f   :  { %2420 = vmatpush1.bf16.msra.mxu0 %v3508_v53  ;;  %v3483_v53 = vld [vmem:[#allocation5 + $0x7ec] ss:$16 sps:$4 sm:$0xff]  }
 0x130   :  { %2421 = vmatprep.subr.bf16.mxu0 %v3513_v54  ;;  %v3481_v54 = vld [vmem:[#allocation5 + $0x7e8] ss:$16 sps:$4 sm:$0xff]  }
 0x131   :  { %1936 = vmatpush1.bf16.msra.mxu1 %v3415_v55  ;;  %v343_v55 = vlaneseq }
 0x132   :  { %1937 = vmatprep.subr.bf16.mxu1 %v3420_v56 }
 0x133   :  { %2422 = vmatpush1.bf16.msra.mxu0 %v3511_v57  ;;  %v3857_v56 = vshrl.u32 %v343_v55, 7 }
 0x134   :  { %2423 = vmatprep.subr.bf16.mxu0 %v3516_v58  ;;  %v3863_v58 = vld [vmem:[%s3900_s2] sm:$0xf] }
 0x135   :  { %1938 = vmatpush1.bf16.msra.mxu1 %v3418_v59  ;;  %v345_v57 = vsub.s32 0, %v3857_v56  ;;  %v349_v59 = vsub.s32 1, %v3857_v56 }
 0x136   :  { %1939 = vmatprep.subr.bf16.mxu1 %v3423_v60 }
 0x137   :  { %2424 = vmatpush1.bf16.msra.mxu0 %v3514_v61  ;;  %v346_v60 = vrot.slane %v3863_v58, %v345_v57 }
 0x138   :  { %2425 = vmatprep.subr.bf16.mxu0 %v3519_v62 }
 0x139   :  { %1940 = vmatpush1.bf16.msra.mxu1 %v3421_v63 }
 0x13a   :  { %1941 = vmatprep.subr.bf16.mxu1 %v3426_v0 }
 0x13b   :  { %2426 = vmatpush1.bf16.msra.mxu0 %v3517_v1 }
 0x13c   :  { %2427 = vmatprep.subr.bf16.mxu0 %v3522_v2 }
 0x13d   :  { %1942 = vmatpush1.bf16.msra.mxu1 %v3424_v3 }
 0x13e   :  { %1943 = vmatprep.subr.bf16.mxu1 %v3429_v4 }
 0x13f   :  { %2428 = vmatpush1.bf16.msra.mxu0 %v3520_v5 }
 0x140   :  { %2429 = vmatprep.subr.bf16.mxu0 %v3525_v8 }
 0x141   :  { %1944 = vmatpush1.bf16.msra.mxu1 %v3427_v9 }
 0x142   :  { %1945 = vmatprep.subr.bf16.mxu1 %v3432_v10  ;;  %v3532_v10 = vld [vmem:[#allocation7 + $0x100] ss:$8 sps:$4 sm:$0xff]  }
 0x143   :  { %2430 = vmatpush1.bf16.msra.mxu0 %v3523_v11 }
 0x144   :  { %2431 = vmatprep.subr.bf16.mxu0 %v3528_v29  ;;  %v3544_v29 = vld [vmem:[#allocation7 + $0x140] ss:$8 sps:$4 sm:$0xff]  }
 0x145   :  { %1946 = vmatpush1.bf16.msra.mxu1 %v3430_v12  ;;  %v3537_v12 = vld [vmem:[#allocation7 + $0x114] ss:$8 sps:$4 sm:$0xff]  }
 0x146   :  { %1947 = vmatprep.subr.bf16.mxu1 %v3435_v14  ;;  %v3580_v14 = vld [vmem:[#allocation8 + $0x40] sm:$0xff]  }
 0x147   :  { %2432 = vmatpush1.bf16.msra.mxu0 %v3526_v7  ;;  %v3589_v7 = vld [vmem:[#allocation8 + $0x20] sm:$0xff]  }
 0x148   :  { %2433 = vmatprep.subr.bf16.mxu0 %v3531_v33  ;;  %v3555_v33 = vld [vmem:[#allocation7 + $0x174] ss:$8 sps:$4 sm:$0xff]  }
 0x149   :  { %1948 = vmatpush1.bf16.msra.mxu1 %v3433_v15  ;;  %v3581_v15 = vld [vmem:[#allocation8] sm:$0xff]  }
 0x14a   :  { %1958 = vmatprep.subr.bf16.mxu1 %v3438_v16  ;;  %v3582_v16 = vld [vmem:[#allocation8 + $0x48] sm:$0xff]  }
 0x14b   :  { %2434 = vmatpush1.bf16.msra.mxu0 %v3529_v35  ;;  %v3553_v35 = vld [vmem:[#allocation7 + $0x170] ss:$8 sps:$4 sm:$0xff]  }
 0x14c   :  { %1950 = vmatmul.mubr.bf16.vlgmr.msra.gmra.mrb[4].mxu1 %v3835_v13  ;;  %v3451_v13 = vld [vmem:[#allocation5 + $0x6a8] ss:$16 sps:$4 sm:$0xff]   ;;  %2444 = vmatprep.subr.bf16.mxu0 %v3534_v38  ;;  %v3561_v38 = vld [vmem:[#allocation7 + $0x194] ss:$8 sps:$4 sm:$0xff]  }
 0x14d   :  { %1959 = vmatpush1.bf16.msra.mxu1 %v3436_v17  ;;  %1990 = vmatprep.mubr.bf16.mxu1 %v3841_v19  ;;  %v3535_v17 = vld [vmem:[#allocation7 + $0x110] ss:$8 sps:$4 sm:$0xff]  }
 0x14e   :  { %1960 = vmatprep.subr.bf16.mxu1 %v3441_v20  ;;  %v3540_v20 = vld [vmem:[#allocation7 + $0x124] ss:$8 sps:$4 sm:$0xff]  }
 0x151   :  { %1961 = vmatpush1.bf16.msra.mxu1 %v3439_v22  ;;  %v3583_v22 = vld [vmem:[#allocation8 + $0x8] sm:$0xff]  }
 0x152   :  { %1962 = vmatprep.subr.bf16.mxu1 %v3444_v23  ;;  %v3584_v23 = vld [vmem:[#allocation8 + $0x50] sm:$0xff]  }
 0x155   :  { %1963 = vmatpush1.bf16.msra.mxu1 %v3442_v24  ;;  %v3538_v24 = vld [vmem:[#allocation7 + $0x120] ss:$8 sps:$4 sm:$0xff]  }
 0x156   :  { %1964 = vmatprep.subr.bf16.mxu1 %v3447_v25  ;;  %v3543_v25 = vld [vmem:[#allocation7 + $0x134] ss:$8 sps:$4 sm:$0xff]  }
 0x159   :  { %1965 = vmatpush1.bf16.msra.mxu1 %v3445_v26  ;;  %v3585_v26 = vld [vmem:[#allocation8 + $0x10] sm:$0xff]  }
 0x15a   :  { %1966 = vmatprep.subr.bf16.mxu1 %v3450_v6  ;;  %v3586_v6 = vld [vmem:[#allocation8 + $0x58] sm:$0xff]  }
 0x15d   :  { %1967 = vmatpush1.bf16.msra.mxu1 %v3448_v18  ;;  %v3541_v18 = vld [vmem:[#allocation7 + $0x130] ss:$8 sps:$4 sm:$0xff]  }
 0x15e   :  { %1968 = vmatprep.subr.bf16.mxu1 %v3453_v27  ;;  %v3546_v27 = vld [vmem:[#allocation7 + $0x144] ss:$8 sps:$4 sm:$0xff]  }
 0x15f   :  { %v1705_v19 = vpop.f32.mrb[0].mxu1 }
 0x160   :  { %v1707_v30 = vpop.f32.mrb[1].mxu1  ;;  %v1706_v61 = vadd.f32 %v1705_v19, %v346_v60  ;;  %v3549_v19 = vld [vmem:[#allocation7 + $0x154] ss:$8 sps:$4 sm:$0xff]  }
 0x161   :  { %v1709_v31 = vpop.f32.mrb[2].mxu1  ;;  %1969 = vmatpush1.bf16.msra.mxu1 %v3451_v13  ;;  %v3587_v13 = vld [vmem:[#allocation8 + $0x18] sm:$0xff]  }
 0x162   :  { %v1710_v34 = vpop.f32.mrb[3].mxu1  ;;  %1970 = vmatprep.subr.bf16.mxu1 %v3456_v28  ;;  %v3588_v28 = vld [vmem:[#allocation8 + $0x60] sm:$0xff]   ;;  %v3547_v31 = vld [vmem:[#allocation7 + $0x150] ss:$8 sps:$4 sm:$0xff]  }
 0x163   :  { %v3591_v34 = vld [vmem:[#allocation8 + $0x28] sm:$0xff]  }
 0x165   :  { %1971 = vmatpush1.bf16.msra.mxu1 %v3454_v32  ;;  %v3552_v32 = vld [vmem:[#allocation7 + $0x164] ss:$8 sps:$4 sm:$0xff]  }
 0x166   :  { %1972 = vmatprep.subr.bf16.mxu1 %v3459_v51  ;;  %v3550_v51 = vld [vmem:[#allocation7 + $0x160] ss:$8 sps:$4 sm:$0xff]  }
 0x169   :  { %1973 = vmatpush1.bf16.msra.mxu1 %v3457_v36  ;;  %v3558_v36 = vld [vmem:[#allocation7 + $0x184] ss:$8 sps:$4 sm:$0xff]  }
 0x16a   :  { %1974 = vmatprep.subr.bf16.mxu1 %v3462_v37  ;;  %v3556_v37 = vld [vmem:[#allocation7 + $0x180] ss:$8 sps:$4 sm:$0xff]  }
 0x16d   :  { %1975 = vmatpush1.bf16.msra.mxu1 %v3460_v39  ;;  %v3559_v39 = vld [vmem:[#allocation7 + $0x190] ss:$8 sps:$4 sm:$0xff]  }
 0x16e   :  { %1976 = vmatprep.subr.bf16.mxu1 %v3465_v40  ;;  %v3564_v40 = vld [vmem:[#allocation7 + $0x1a4] ss:$8 sps:$4 sm:$0xff]  }
 0x171   :  { %1977 = vmatpush1.bf16.msra.mxu1 %v3463_v41  ;;  %v3562_v41 = vld [vmem:[#allocation7 + $0x1a0] ss:$8 sps:$4 sm:$0xff]  }
 0x172   :  { %1978 = vmatprep.subr.bf16.mxu1 %v3468_v42  ;;  %v3567_v42 = vld [vmem:[#allocation7 + $0x1b4] ss:$8 sps:$4 sm:$0xff]  }
 0x175   :  { %1979 = vmatpush1.bf16.msra.mxu1 %v3466_v43  ;;  %v3565_v43 = vld [vmem:[#allocation7 + $0x1b0] ss:$8 sps:$4 sm:$0xff]  }
 0x176   :  { %1980 = vmatprep.subr.bf16.mxu1 %v3471_v44  ;;  %v3570_v44 = vld [vmem:[#allocation7 + $0x1c4] ss:$8 sps:$4 sm:$0xff]  }
 0x179   :  { %1981 = vmatpush1.bf16.msra.mxu1 %v3469_v45  ;;  %v3568_v45 = vld [vmem:[#allocation7 + $0x1c0] ss:$8 sps:$4 sm:$0xff]  }
 0x17a   :  { %1982 = vmatprep.subr.bf16.mxu1 %v3474_v46  ;;  %v3573_v46 = vld [vmem:[#allocation7 + $0x1d4] ss:$8 sps:$4 sm:$0xff]  }
 0x17d   :  { %1983 = vmatpush1.bf16.msra.mxu1 %v3472_v47  ;;  %v3571_v47 = vld [vmem:[#allocation7 + $0x1d0] ss:$8 sps:$4 sm:$0xff]  }
 0x17e   :  { %1984 = vmatprep.subr.bf16.mxu1 %v3477_v48  ;;  %v3576_v48 = vld [vmem:[#allocation7 + $0x1e4] ss:$8 sps:$4 sm:$0xff]  }
 0x181   :  { %1985 = vmatpush1.bf16.msra.mxu1 %v3475_v49  ;;  %v3574_v49 = vld [vmem:[#allocation7 + $0x1e0] ss:$8 sps:$4 sm:$0xff]  }
 0x182   :  { %1986 = vmatprep.subr.bf16.mxu1 %v3480_v50  ;;  %v3579_v50 = vld [vmem:[#allocation7 + $0x1f4] ss:$8 sps:$4 sm:$0xff]  }
 0x185   :  { %1987 = vmatpush1.bf16.msra.mxu1 %v3478_v52  ;;  %v3577_v52 = vld [vmem:[#allocation7 + $0x1f0] ss:$8 sps:$4 sm:$0xff]  }
 0x186   :  { %1988 = vmatprep.subr.bf16.mxu1 %v3483_v53  ;;  %v353_v53 = vsub.s32 2, %v3857_v56 }
 0x188   :  { %v354_v55 = vrot.slane %v3863_v58, %v353_v53 }
 0x189   :  { %1989 = vmatpush1.bf16.msra.mxu1 %v3481_v54  ;;  %v357_v54 = vsub.s32 3, %v3857_v56 }
 0x18a   :  { %3027 = vmatprep.subr.bf16.mxu1 %v3580_v14 }
 0x18b   :  { %v358_v60 = vrot.slane %v3863_v58, %v357_v54 }
 0x18c   :  { %1991 = vmatmul.mubr.bf16.vlgmr.msra.gmra.mrb[4].mxu1 %v3849_v21  ;;  %v350_v21 = vrot.slane %v3863_v58, %v349_v59  ;;  %v2071_v58 = vld [vmem:[%s3902_s4] sm:$0x3] }
 0x18d   :  { %3028 = vmatpush3.bf16.msra.mxu1 %v3581_v15  ;;  %v2080_v14 = vrot.slane %v2071_v58, %v349_v59 }
 0x18e   :  { %v1708_v62 = vadd.f32 %v1707_v30, %v350_v21  ;;  %3029 = vmatprep.subr.bf16.mxu1 %v3582_v16  ;;  %v3590_v30 = vld [vmem:[#allocation8 + $0x68] sm:$0xff]  }
 0x191   :  { %3030 = vmatpush3.bf16.msra.mxu1 %v3583_v22 }
 0x192   :  { %3031 = vmatprep.subr.bf16.mxu1 %v3584_v23 }
 0x195   :  { %3032 = vmatpush3.bf16.msra.mxu1 %v3585_v26 }
 0x196   :  { %3033 = vmatprep.subr.bf16.mxu1 %v3586_v6 }
 0x199   :  { %3034 = vmatpush3.bf16.msra.mxu1 %v3587_v13 }
 0x19a   :  { %3035 = vmatprep.subr.bf16.mxu1 %v3588_v28 }
 0x19d   :  { %3036 = vmatpush3.bf16.msra.mxu1 %v3589_v7 }
 0x19e   :  { %3037 = vmatprep.subr.bf16.mxu1 %v3590_v30 }
 0x1a1   :  { %3038 = vmatpush3.bf16.msra.mxu1 %v3591_v34 }
 0x1e0   :  { %v1828_v63 = vpop.f32.mrb[0].mxu0 }
 0x1e1   :  { %v3050_v0 = vadd.f32 %v1828_v63, %v1706_v61  ;;  %v1830_v1 = vpop.f32.mrb[1].mxu0 }
 0x1e2   :  { %v3052_v2 = vadd.f32 %v1830_v1, %v1708_v62  ;;  %v1832_v3 = vpop.f32.mrb[2].mxu0 }
 0x1e3   :  { %v1999_v4 = vmax.f32 %v3050_v0, 0.0  ;;  %v1833_v5 = vpop.f32.mrb[3].mxu0 }
 0x1e4   :  { %v2000_v8 = vmax.f32 %v3052_v2, 0.0 }
 0x1e5   :  { %v2003_v11 = vpack.c.bf16 %v1999_v4, %v1999_v4 }
 0x1e6   :  { %v2004_v9 = vpack.c.bf16 %v2000_v8, %v2000_v8  ;;  %v3592_v8 = vld [vmem:[#allocation8 + $0x70] sm:$0xff]  }
 0x1e7   :  { %3039 = vmatprep.subr.bf16.mxu1 %v3592_v8 }
 0x1e8   :  { %2435 = vmatprep.mubr.bf16.mxu0 %v2004_v9  ;;  %v3593_v9 = vld [vmem:[#allocation8 + $0x30] sm:$0xff]  }
 0x1e9   :  { %2436 = vmatmul.mubr.bf16.vlgmr.msra.gmra.mrb[4].mxu0 %v2003_v11  ;;  %3040 = vmatpush3.bf16.msra.mxu1 %v3593_v9  ;;  %v3595_v11 = vld [vmem:[#allocation8 + $0x38] sm:$0xff]  }
 0x1ea   :  { %2445 = vmatpush1.bf16.msra.mxu0 %v3532_v10  ;;  %v3594_v10 = vld [vmem:[#allocation8 + $0x78] sm:$0xff]  }
 0x1eb   :  { %2446 = vmatprep.subr.bf16.mxu0 %v3537_v12  ;;  %3041 = vmatprep.subr.bf16.mxu1 %v3594_v10  ;;  %v2076_v12 = vrot.slane %v2071_v58, %v345_v57  ;;  %v3010_v57 = vld [vmem:[%s3904_s6] ss:$0 sm:$0xff] }
 0x1ed   :  { %3042 = vmatpush3.bf16.msra.mxu1 %v3595_v11 }
 0x1ee   :  { %2447 = vmatpush1.bf16.msra.mxu0 %v3535_v17 }
 0x1ef   :  { %2448 = vmatprep.subr.bf16.mxu0 %v3540_v20 }
 0x1f2   :  { %2449 = vmatpush1.bf16.msra.mxu0 %v3538_v24 }
 0x1f3   :  { %2450 = vmatprep.subr.bf16.mxu0 %v3543_v25 }
 0x1f6   :  { %2451 = vmatpush1.bf16.msra.mxu0 %v3541_v18 }
 0x1f7   :  { %2452 = vmatprep.subr.bf16.mxu0 %v3546_v27 }
 0x1fa   :  { %2453 = vmatpush1.bf16.msra.mxu0 %v3544_v29 }
 0x1fb   :  { %2454 = vmatprep.subr.bf16.mxu0 %v3549_v19 }
 0x1fe   :  { %2455 = vmatpush1.bf16.msra.mxu0 %v3547_v31 }
 0x1ff   :  { %2456 = vmatprep.subr.bf16.mxu0 %v3552_v32 }
 0x202   :  { %2457 = vmatpush1.bf16.msra.mxu0 %v3550_v51 }
 0x203   :  { %2458 = vmatprep.subr.bf16.mxu0 %v3555_v33 }
 0x206   :  { %2459 = vmatpush1.bf16.msra.mxu0 %v3553_v35 }
 0x207   :  { %2460 = vmatprep.subr.bf16.mxu0 %v3558_v36 }
 0x20a   :  { %2461 = vmatpush1.bf16.msra.mxu0 %v3556_v37 }
 0x20b   :  { %2462 = vmatprep.subr.bf16.mxu0 %v3561_v38 }
 0x20e   :  { %2463 = vmatpush1.bf16.msra.mxu0 %v3559_v39 }
 0x20f   :  { %2464 = vmatprep.subr.bf16.mxu0 %v3564_v40 }
 0x212   :  { %2465 = vmatpush1.bf16.msra.mxu0 %v3562_v41 }
 0x213   :  { %2466 = vmatprep.subr.bf16.mxu0 %v3567_v42 }
 0x216   :  { %2467 = vmatpush1.bf16.msra.mxu0 %v3565_v43 }
 0x217   :  { %2468 = vmatprep.subr.bf16.mxu0 %v3570_v44 }
 0x21a   :  { %2469 = vmatpush1.bf16.msra.mxu0 %v3568_v45 }
 0x21b   :  { %2470 = vmatprep.subr.bf16.mxu0 %v3573_v46 }
 0x21e   :  { %2471 = vmatpush1.bf16.msra.mxu0 %v3571_v47 }
 0x21f   :  { %2472 = vmatprep.subr.bf16.mxu0 %v3576_v48 }
 0x222   :  { %2473 = vmatpush1.bf16.msra.mxu0 %v3574_v49 }
 0x223   :  { %2474 = vmatprep.subr.bf16.mxu0 %v3579_v50 }
 0x226   :  { %2475 = vmatpush1.bf16.msra.mxu0 %v3577_v52 }
 0x25f   :  { %v1992_v21 = vpop.f32.mrb[4].mxu1 }
 0x260   :  { %v3053_v61 = vadd.f32 %v1992_v21, %v354_v55  ;;  %v1994_v62 = vpop.f32.mrb[5].mxu1 }
 0x261   :  { %v3054_v63 = vadd.f32 %v1994_v62, %v358_v60  ;;  %v1996_v0 = vpop.f32.mrb[6].mxu1 }
 0x262   :  { %v2001_v1 = vmax.f32 %v3053_v61, 0.0  ;;  %v1997_v2 = vpop.f32.mrb[7].mxu1 }
 0x263   :  { %v2002_v3 = vmax.f32 %v3054_v63, 0.0 }
 0x264   :  { %v2005_v5 = vpack.c.bf16 %v2001_v1, %v2001_v1 }
 0x265   :  { %v2006_v4 = vpack.c.bf16 %v2002_v3, %v2002_v3 }
 0x267   :  { %2476 = vmatprep.mubr.bf16.mxu0 %v2006_v4 }
 0x268   :  { %2477 = vmatmul.mubr.bf16.vlgmr.msra.gmra.mrb[4].mxu0 %v2005_v5 }
 0x33b   :  { %v2478_v15 = vpop.f32.mrb[4].mxu0 }
 0x33c   :  { %v3055_v16 = vadd.f32 %v2478_v15, %v2076_v12  ;;  %v2480_v17 = vpop.f32.mrb[5].mxu0 }
 0x33d   :  { %v3056_v20 = vadd.f32 %v2480_v17, %v2080_v14  ;;  %v2482_v22 = vpop.f32.mrb[6].mxu0 }
 0x33e   :  { %v2485_v23 = vmax.f32 %v3055_v16, 0.0  ;;  %v2483_v24 = vpop.f32.mrb[7].mxu0 }
 0x33f   :  { %v2486_v25 = vmax.f32 %v3056_v20, 0.0 }
 0x340   :  { %v2487_v6 = vpack.c.bf16 %v2485_v23, %v2485_v23 }
 0x341   :  { %v2488_v26 = vpack.c.bf16 %v2486_v25, %v2486_v25 }
 0x343   :  { %2656 = vmatprep.mubr.bf16.mxu1 %v2488_v26 }
 0x344   :  { %2657 = vmatmul.mubr.bf16.vlgmr.msra.gmra.mrb[8].mxu1 %v2487_v6 }
 0x417   :  { %v3043_v18 = vpop.f32.mrb[8].mxu1 }
 0x418   :  { %v3044_v27 = vpop.f32.mrb[9].mxu1 }
 0x419   :  { %v3045_v56 = vadd.f32 %v3044_v27, %v3043_v18  ;;  %v3046_v59 = vpop.f32.mrb[10].mxu1 }
 0x41a   :  { %v3047_v13 = vpop.f32.mrb[11].mxu1 }
 0x41b   :  { %v2659_v28 = vadd.f32 %v3045_v56, %v3010_v57 }
 0x41d   :  { %2664 = vst [vmem:[#allocation10] sm:$0xff] %v2659_v28 }
 0x41e   :  { %3695 = shalt.err (!%p3692_p8)
}
 0x41f   :  { %s3696_s6 = scalar_lea.hbm %s3905_s7, 128 }
 0x420   :  { %p3697_p9 = scmp.ne.s32.totalorder %s3905_s7, %s3696_s6  ;;  %p3700_p10 = scmp.lt.u32.totalorder %s3696_s6, %s3905_s7 }
 0x422   :  { %p3702_p11 = pnand %p3700_p10, %p3697_p9 }
 0x424   :  { %3705 = shalt.err (!%p3702_p11)
}
 0x425   :  { %2674 = dma.vmem_to_hbm [thread:$0]  %s2672_s9, 128, %s3905_s7, [#allocation4]  }
 0x426   :  { %3712 = dma.done.wait [#allocation4], 128  }
 0x427   :  { %3713 = vsyncadd [#allocation4], 4294967168 }
 0x428   :  { %2678 = vsyncpa [#allocation3], 1 }
 0x429   :  { %2679 = vsyncpa [#allocation6], 1 }
 0x42a   :  { %2680 = vsyncpa [#allocation9], 1 }
 0x42b   :  { %2681 = vsyncpa [#allocation4], 1 }

</bundles_post_ra>
